<compile_context>
chip_gen: v7x
topology: tpu7x:2x2x1
jax: 0.10.0
libtpu: 0.0.40
codegen_flags: <defaults>
</compile_context>

<pallas_src>
import functools

import jax
import jax.numpy as jnp
from jax import lax
from jax.experimental import pallas as pl
from jax.experimental.pallas import tpu as pltpu


# MXU operand dtype.  float32 keeps exact parity with the PyTorch reference;
# switch to jnp.bfloat16 on v6e/v7x to halve DMA bytes and double MXU
# throughput (accumulation stays f32 via preferred_element_type, epilogue f32).
OPERAND_DTYPE = jnp.float32

# Row tile used only when M is large (gives v7x's second TensorCore a
# "parallel" grid axis and bounds VMEM for big batches).
_TM = 256


# ---------------------------------------------------------------------------
# Fused Pallas kernels
# ---------------------------------------------------------------------------
def _make_mm_kernel(act):
    """o = act(x @ w + b); whole operands resident in VMEM."""

    def kernel(x_ref, w_ref, b_ref, o_ref):
        y = jnp.dot(x_ref[...], w_ref[...], preferred_element_type=jnp.float32)
        y = y + b_ref[...]
        if act == "relu":
            y = jnp.maximum(y, 0.0)
        elif act == "sigmoid":
            y = jax.nn.sigmoid(y)
        o_ref[...] = y.astype(o_ref.dtype)

    return kernel


def matmul_bias_act(x, w, b, act="none"):
    """Y[M,N] = act(X[M,K] @ W[K,N] + b[N]) as a single fused Pallas call.

    Weights arrive already BN-folded and in matmul layout (preprocessed once
    at init), so there is no per-call pad/reshape/transpose and no separate
    scale input.  Small shapes -> single whole-array block; large divisible M
    -> row-tiled grid with a parallel axis.
    """
    M, K = x.shape
    Kw, N = w.shape
    assert K == Kw
    x = x.astype(OPERAND_DTYPE)
    b2 = b.reshape(1, N).astype(jnp.float32)
    kernel = _make_mm_kernel(act)

    if M % _TM == 0 and M // _TM >= 2:
        return pl.pallas_call(
            kernel,
            out_shape=jax.ShapeDtypeStruct((M, N), jnp.float32),
            grid=(M // _TM,),
            in_specs=[
                pl.BlockSpec((_TM, K), lambda i: (i, 0)),
                pl.BlockSpec((K, N), lambda i: (0, 0)),
                pl.BlockSpec((1, N), lambda i: (0, 0)),
            ],
            out_specs=pl.BlockSpec((_TM, N), lambda i: (i, 0)),
            compiler_params=pltpu.CompilerParams(
                dimension_semantics=("parallel",)
            ),
        )(x, w, b2)

    # Single-block path: every operand is one whole VMEM block (legal because
    # block_shape == full array dims), no grid, no accumulator scratch.
    return pl.pallas_call(
        kernel,
        out_shape=jax.ShapeDtypeStruct((M, N), jnp.float32),
    )(x, w, b2)


def _latent_kernel(f_ref, w1_ref, b1_ref, w2_ref, b2_ref, lat_ref, dfeat_ref):
    """Fused latent_mapper (Linear+BN1d) and inv_latent_mapper (Linear+ReLU)."""
    lat = jnp.dot(f_ref[...], w1_ref[...], preferred_element_type=jnp.float32)
    lat = lat + b1_ref[...]
    lat_ref[...] = lat
    df = jnp.dot(lat.astype(w2_ref.dtype), w2_ref[...],
                 preferred_element_type=jnp.float32)
    df = df + b2_ref[...]
    dfeat_ref[...] = jnp.maximum(df, 0.0)


def latent_roundtrip(feats, p_lat, p_inv):
    """latents = BN(Linear(feats)); dfeat = relu(Linear(latents)) — one call."""
    B = feats.shape[0]
    latent_dim = p_lat["w"].shape[1]
    feat_dim = p_inv["w"].shape[1]
    return pl.pallas_call(
        _latent_kernel,
        out_shape=(
            jax.ShapeDtypeStruct((B, latent_dim), jnp.float32),
            jax.ShapeDtypeStruct((B, feat_dim), jnp.float32),
        ),
    )(
        feats.astype(OPERAND_DTYPE),
        p_lat["w"], p_lat["b"].reshape(1, latent_dim).astype(jnp.float32),
        p_inv["w"], p_inv["b"].reshape(1, feat_dim).astype(jnp.float32),
    )


# ---------------------------------------------------------------------------
# NHWC glue: patch extraction + layer wrappers
# ---------------------------------------------------------------------------
def im2col_nhwc(x, k, s, pad):
    """Extract k x k stride-s patches (NHWC) via cheap strided slices.

    Returns (B*Ho*Wo, k*k*C) with K-index ordered (kh, kw, c), matching the
    init-time weight layout.  No gather, no transpose.
    """
    B, H, W, C = x.shape
    Ho = (H + 2 * pad - k) // s + 1
    Wo = (W + 2 * pad - k) // s + 1
    xp = jnp.pad(x, ((0, 0), (pad, pad), (pad, pad), (0, 0)))
    taps = []
    for a in range(k):
        for bb in range(k):
            taps.append(
                xp[:, a:a + (Ho - 1) * s + 1:s, bb:bb + (Wo - 1) * s + 1:s, :]
            )
    patches = jnp.stack(taps, axis=3)  # (B, Ho, Wo, k*k, C)
    return patches.reshape(B * Ho * Wo, k * k * C), Ho, Wo


def conv2d_s2(x, w_mat, b_vec, act):
    """Conv2d(k=4, s=2, p=1, bias=False) + folded BN + activation (NHWC)."""
    B = x.shape[0]
    Cout = w_mat.shape[1]
    patches, Ho, Wo = im2col_nhwc(x, k=4, s=2, pad=1)
    y = matmul_bias_act(patches, w_mat, b_vec, act)
    return y.reshape(B, Ho, Wo, Cout)


def conv_transpose2d_s2(x, w_mat, b_vec, act):
    """ConvTranspose2d(k=4, s=2, p=1, bias=False) + folded BN + act (NHWC).

    Sub-pixel decomposition: one matmul over 2x2 stride-1 windows of the
    original input (K = 4*Cin, N = 4*Cout), followed by interleaving the four
    sub-grids into the 2x-upsampled output.
    """
    B, H, W, _ = x.shape
    Cout = w_mat.shape[1] // 4
    patches, Ho, Wo = im2col_nhwc(x, k=2, s=1, pad=1)  # Ho = H+1, Wo = W+1
    y = matmul_bias_act(patches, w_mat, b_vec, act)
    y = y.reshape(B, Ho, Wo, 2, 2, Cout)               # (..., r, s, Cout)
    y00 = y[:, 0:H,     0:W,     0, 0]
    y01 = y[:, 0:H,     1:W + 1, 0, 1]
    y10 = y[:, 1:H + 1, 0:W,     1, 0]
    y11 = y[:, 1:H + 1, 1:W + 1, 1, 1]
    top = jnp.stack([y00, y01], axis=3)                # (B, H, W, 2, Cout)
    bot = jnp.stack([y10, y11], axis=3)
    out = jnp.stack([top, bot], axis=2)                # (B, H, 2, W, 2, Cout)
    return out.reshape(B, 2 * H, 2 * W, Cout)


# ---------------------------------------------------------------------------
# Parameter construction (PyTorch layout) and one-time preprocessing
# ---------------------------------------------------------------------------
def init_raw_params(key, in_channels, hidden_dims, latent_dim):
    """Synthetic parameters in PyTorch layout (weights + BN running stats)."""

    def nxt():
        nonlocal key
        key, sub = jax.random.split(key)
        return sub

    def bn(c):
        return dict(
            gamma=jax.random.uniform(nxt(), (c,), jnp.float32, 0.5, 1.5),
            beta=0.1 * jax.random.normal(nxt(), (c,), jnp.float32),
            mean=0.1 * jax.random.normal(nxt(), (c,), jnp.float32),
            var=jax.random.uniform(nxt(), (c,), jnp.float32, 0.5, 1.5),
        )

    raw = {"encoder": [], "decoder": []}

    c_prev = in_channels
    for i, c in enumerate(hidden_dims):
        raw["encoder"].append({
            "w": 0.1 * jax.random.normal(nxt(), (c, c_prev, 4, 4), jnp.float32),
            "bn": bn(c) if i > 0 else None,
        })
        c_prev = c

    feat = hidden_dims[-1] * 2 * 2
    raw["latent_mapper"] = {
        "w": 0.1 * jax.random.normal(nxt(), (latent_dim, feat), jnp.float32),
        "b": 0.1 * jax.random.normal(nxt(), (latent_dim,), jnp.float32),
        "bn": bn(latent_dim),
    }
    raw["inv_latent_mapper"] = {
        "w": 0.1 * jax.random.normal(nxt(), (feat, latent_dim), jnp.float32),
        "b": 0.1 * jax.random.normal(nxt(), (feat,), jnp.float32),
    }

    dims = list(reversed(hidden_dims)) + [in_channels]
    for i in range(len(dims) - 1):
        cin, cout = dims[i], dims[i + 1]
        raw["decoder"].append({
            "w": 0.1 * jax.random.normal(nxt(), (cin, cout, 4, 4), jnp.float32),
            "bn": bn(cout) if i < len(dims) - 2 else None,
        })
    return raw


def _bn_fold(bn, c, eps=1e-5):
    if bn is None:
        return jnp.ones((c,), jnp.float32), jnp.zeros((c,), jnp.float32)
    scale = bn["gamma"] / jnp.sqrt(bn["var"] + eps)
    bias = bn["beta"] - bn["mean"] * scale
    return scale, bias


# kernel-tap selector for the conv-transpose sub-pixel decomposition:
# output sub-row r uses kernel rows _SEL[r] over the two input rows of the
# 2x2 window (same for columns).
_SEL = jnp.array([[3, 1], [2, 0]], dtype=jnp.int32)


def preprocess_params(raw, hidden_dims, latent_dim):
    """One-time conversion to matmul-layout, BN-folded kernel operands."""
    params = {"encoder": [], "decoder": []}

    # Encoder convs: (Cout, Cin, kh, kw) -> (kh*kw*Cin, Cout), BN scale folded.
    for layer in raw["encoder"]:
        w = layer["w"]
        cout = w.shape[0]
        scale, bias = _bn_fold(layer["bn"], cout)
        w_mat = jnp.transpose(w, (2, 3, 1, 0)).reshape(-1, cout) * scale[None, :]
        params["encoder"].append({"w": w_mat.astype(OPERAND_DTYPE), "b": bias})

    C = hidden_dims[-1]

    # Latent mapper (Linear + BN1d): fold BN, permute feature columns from the
    # PyTorch NCHW flatten order to this pipeline's NHWC flatten order.
    lm = raw["latent_mapper"]
    scale, bn_bias = _bn_fold(lm["bn"], latent_dim)
    w1 = lm["w"].reshape(latent_dim, C, 2, 2)
    w1 = jnp.transpose(w1, (0, 2, 3, 1)).reshape(latent_dim, 4 * C)
    w1 = (w1 * scale[:, None]).T                    # (feat_nhwc, latent)
    b1 = lm["b"] * scale + bn_bias
    params["latent_mapper"] = {"w": w1.astype(OPERAND_DTYPE), "b": b1}

    # Inverse latent mapper (Linear + ReLU): permute output rows to NHWC order.
    ilm = raw["inv_latent_mapper"]
    w2 = ilm["w"].reshape(C, 2, 2, latent_dim)
    w2 = jnp.transpose(w2, (1, 2, 0, 3)).reshape(4 * C, latent_dim).T
    b2 = jnp.transpose(ilm["b"].reshape(C, 2, 2), (1, 2, 0)).reshape(-1)
    params["inv_latent_mapper"] = {"w": w2.astype(OPERAND_DTYPE), "b": b2}

    # Decoder conv-transposes: build the combined sub-pixel weight
    # (2*2*Cin, 2*2*Cout) with BN scale folded; column index = (r, s, cout).
    for layer in raw["decoder"]:
        w = layer["w"]                              # (Cin, Cout, 4, 4)
        cin, cout = w.shape[0], w.shape[1]
        scale, bias = _bn_fold(layer["bn"], cout)
        w_rows = w[:, :, _SEL, :]                   # (Cin, Cout, r, a, kw)
        w_full = w_rows[:, :, :, :, _SEL]           # (Cin, Cout, r, a, s, b)
        w_perm = jnp.transpose(w_full, (3, 5, 0, 2, 4, 1))  # (a, b, Cin, r, s, Cout)
        w_mat = (w_perm * scale[None, None, None, None, None, :]).reshape(
            4 * cin, 4 * cout)
        b_vec = jnp.tile(bias, 4)
        params["decoder"].append({"w": w_mat.astype(OPERAND_DTYPE), "b": b_vec})

    return params


# ---------------------------------------------------------------------------
# Forward pass (Pallas) and pure-JAX reference
# ---------------------------------------------------------------------------
def vanilla_conv_ae_forward(x_nchw, params, hidden_dims):
    """Forward pass.  External layout is NCHW (PyTorch convention); the whole
    internal pipeline is NHWC so there are no per-layer transposes."""
    h = jnp.transpose(x_nchw, (0, 2, 3, 1))         # NCHW -> NHWC, once

    for layer in params["encoder"]:
        h = conv2d_s2(h, layer["w"], layer["b"], act="relu")

    B = h.shape[0]
    feats = h.reshape(B, -1)                        # NHWC flatten (weights permuted to match)
    latents, dfeat = latent_roundtrip(
        feats, params["latent_mapper"], params["inv_latent_mapper"])

    h = dfeat.reshape(B, 2, 2, hidden_dims[-1])
    n_dec = len(params["decoder"])
    for i, layer in enumerate(params["decoder"]):
        act = "sigmoid" if i == n_dec - 1 else "relu"
        h = conv_transpose2d_s2(h, layer["w"], layer["b"], act)

    recons = jnp.transpose(h, (0, 3, 1, 2))         # NHWC -> NCHW, once
    return {"recons": recons, "latents": latents}


def reference_forward(x, raw, hidden_dims, eps=1e-5):
    """Pure-JAX NCHW reference of the PyTorch module (for validation only)."""

    def bn_apply(h, bn):
        if bn is None:
            return h
        scale = bn["gamma"] / jnp.sqrt(bn["var"] + eps)
        bias = bn["beta"] - bn["mean"] * scale
        return h * scale[None, :, None, None] + bias[None, :, None, None]

    h = x
    for layer in raw["encoder"]:
        h = lax.conv_general_dilated(
            h, layer["w"], window_strides=(2, 2), padding=((1, 1), (1, 1)),
            dimension_numbers=("NCHW", "OIHW", "NCHW"),
            precision=lax.Precision.HIGHEST)
        h = jnp.maximum(bn_apply(h, layer["bn"]), 0.0)

    B = h.shape[0]
    feats = h.reshape(B, -1)

    lm = raw["latent_mapper"]
    lat = jnp.dot(feats, lm["w"].T, precision=lax.Precision.HIGHEST) + lm["b"]
    bn = lm["bn"]
    scale = bn["gamma"] / jnp.sqrt(bn["var"] + eps)
    lat = lat * scale + (bn["beta"] - bn["mean"] * scale)

    ilm = raw["inv_latent_mapper"]
    dfeat = jnp.maximum(
        jnp.dot(lat, ilm["w"].T, precision=lax.Precision.HIGHEST) + ilm["b"], 0.0)
    h = dfeat.reshape(B, hidden_dims[-1], 2, 2)

    n_dec = len(raw["decoder"])
    for i, layer in enumerate(raw["decoder"]):
        w_conv = jnp.transpose(jnp.flip(layer["w"], (2, 3)), (1, 0, 2, 3))
        h = lax.conv_general_dilated(
            h, w_conv, window_strides=(1, 1), padding=((2, 2), (2, 2)),
            lhs_dilation=(2, 2), dimension_numbers=("NCHW", "OIHW", "NCHW"),
            precision=lax.Precision.HIGHEST)
        h = bn_apply(h, layer["bn"])
        h = jnp.maximum(h, 0.0) if i < n_dec - 1 else jax.nn.sigmoid(h)

    return {"recons": h, "latents": lat}


# ---------------------------------------------------------------------------
if __name__ == "__main__":
    # Small config consistent with the module: encoder output feature map is
    # 2x2, so spatial = 2 * 2**len(hidden_dims).
    in_channels = 1
    hidden_dims = [8, 16, 32]
    latent_dim = 16
    batch = 2
    spatial = 2 * (2 ** len(hidden_dims))  # 16

    key = jax.random.PRNGKey(0)
    key, xkey = jax.random.split(key)
    x = jax.random.normal(xkey, (batch, in_channels, spatial, spatial), jnp.float32)

    raw = init_raw_params(key, in_channels, hidden_dims, latent_dim)
    params = preprocess_params(raw, hidden_dims, latent_dim)  # one-time init cost

    fwd = jax.jit(functools.partial(vanilla_conv_ae_forward, hidden_dims=hidden_dims))
    out = fwd(x, params)
    jax.block_until_ready(out)

    assert out["recons"].shape == (batch, in_channels, spatial, spatial)
    assert out["latents"].shape == (batch, latent_dim)
    assert bool(jnp.all(jnp.isfinite(out["recons"])))
    assert bool(jnp.all(jnp.isfinite(out["latents"])))
    assert bool(jnp.all((out["recons"] >= 0.0) & (out["recons"] <= 1.0)))

    # Cross-check the Pallas pipeline against a pure-JAX NCHW reference.
    ref = reference_forward(x, raw, hidden_dims)
    assert bool(jnp.allclose(out["latents"], ref["latents"], atol=1e-3, rtol=1e-3))
    assert bool(jnp.allclose(out["recons"], ref["recons"], atol=1e-3, rtol=1e-3))

    print("KERNEL_OK")
</pallas_src>

<mosaic_0001>
module attributes {stable_mosaic.version = 11 : i64} {
  func.func @kernel(%arg0: memref<128x16xf32, #tpu.memory_space<vmem>>, %arg1: memref<16x8xf32, #tpu.memory_space<vmem>>, %arg2: memref<1x8xf32, #tpu.memory_space<vmem>>, %arg3: memref<128x8xf32, #tpu.memory_space<vmem>>) attributes {dimension_semantics = [], scalar_prefetch = 0 : i64, scratch_operands = 0 : i64, tpu.core_type = #tpu.core_type<tc>} {
    %c0 = arith.constant 0 : index
    %c0_0 = arith.constant 0 : index
    %0 = vector.load %arg0[%c0, %c0_0] : memref<128x16xf32, #tpu.memory_space<vmem>>, vector<128x16xf32>
    %c0_1 = arith.constant 0 : index
    %c0_2 = arith.constant 0 : index
    %1 = vector.load %arg1[%c0_1, %c0_2] : memref<16x8xf32, #tpu.memory_space<vmem>>, vector<16x8xf32>
    %cst = arith.constant dense<0.000000e+00> : vector<128x8xf32>
    %2 = tpu.matmul %0, %1, %cst {dimension_numbers = #tpu.dot_dimension_numbers<[1], [0], [0], [1], [0, 0, 1, 1], [], []>} : vector<128x16xf32>, vector<16x8xf32>, vector<128x8xf32> -> vector<128x8xf32>
    %c0_3 = arith.constant 0 : index
    %c0_4 = arith.constant 0 : index
    %3 = vector.load %arg2[%c0_3, %c0_4] : memref<1x8xf32, #tpu.memory_space<vmem>>, vector<1x8xf32>
    %4 = vector.broadcast %3 : vector<1x8xf32> to vector<128x8xf32>
    %5 = arith.addf %2, %4 : vector<128x8xf32>
    %cst_5 = arith.constant 0.000000e+00 : f32
    %6 = vector.broadcast %cst_5 : f32 to vector<128x8xf32>
    %7 = arith.maximumf %5, %6 : vector<128x8xf32>
    %c0_6 = arith.constant 0 : index
    %c0_7 = arith.constant 0 : index
    %8 = vector.load %arg3[%c0_6, %c0_7] : memref<128x8xf32, #tpu.memory_space<vmem>>, vector<128x8xf32>
    tpu.vector_store %arg3[%c0_6, %c0_7], %7 {strides = array<i32>} : memref<128x8xf32, #tpu.memory_space<vmem>>, vector<128x8xf32>,
    return
  }
}

module attributes {stable_mosaic.version = 11 : i64} {
  func.func @kernel(%arg0: memref<32x128xf32, #tpu.memory_space<vmem>>, %arg1: memref<128x16xf32, #tpu.memory_space<vmem>>, %arg2: memref<1x16xf32, #tpu.memory_space<vmem>>, %arg3: memref<32x16xf32, #tpu.memory_space<vmem>>) attributes {dimension_semantics = [], scalar_prefetch = 0 : i64, scratch_operands = 0 : i64, tpu.core_type = #tpu.core_type<tc>} {
    %c0 = arith.constant 0 : index
    %c0_0 = arith.constant 0 : index
    %0 = vector.load %arg0[%c0, %c0_0] : memref<32x128xf32, #tpu.memory_space<vmem>>, vector<32x128xf32>
    %c0_1 = arith.constant 0 : index
    %c0_2 = arith.constant 0 : index
    %1 = vector.load %arg1[%c0_1, %c0_2] : memref<128x16xf32, #tpu.memory_space<vmem>>, vector<128x16xf32>
    %cst = arith.constant dense<0.000000e+00> : vector<32x16xf32>
    %2 = tpu.matmul %0, %1, %cst {dimension_numbers = #tpu.dot_dimension_numbers<[1], [0], [0], [1], [0, 0, 1, 1], [], []>} : vector<32x128xf32>, vector<128x16xf32>, vector<32x16xf32> -> vector<32x16xf32>
    %c0_3 = arith.constant 0 : index
    %c0_4 = arith.constant 0 : index
    %3 = vector.load %arg2[%c0_3, %c0_4] : memref<1x16xf32, #tpu.memory_space<vmem>>, vector<1x16xf32>
    %4 = vector.broadcast %3 : vector<1x16xf32> to vector<32x16xf32>
    %5 = arith.addf %2, %4 : vector<32x16xf32>
    %cst_5 = arith.constant 0.000000e+00 : f32
    %6 = vector.broadcast %cst_5 : f32 to vector<32x16xf32>
    %7 = arith.maximumf %5, %6 : vector<32x16xf32>
    %c0_6 = arith.constant 0 : index
    %c0_7 = arith.constant 0 : index
    %8 = vector.load %arg3[%c0_6, %c0_7] : memref<32x16xf32, #tpu.memory_space<vmem>>, vector<32x16xf32>
    tpu.vector_store %arg3[%c0_6, %c0_7], %7 {strides = array<i32>} : memref<32x16xf32, #tpu.memory_space<vmem>>, vector<32x16xf32>,
    return
  }
}

module attributes {stable_mosaic.version = 11 : i64} {
  func.func @kernel(%arg0: memref<8x256xf32, #tpu.memory_space<vmem>>, %arg1: memref<256x32xf32, #tpu.memory_space<vmem>>, %arg2: memref<1x32xf32, #tpu.memory_space<vmem>>, %arg3: memref<8x32xf32, #tpu.memory_space<vmem>>) attributes {dimension_semantics = [], scalar_prefetch = 0 : i64, scratch_operands = 0 : i64, tpu.core_type = #tpu.core_type<tc>} {
    %c0 = arith.constant 0 : index
    %c0_0 = arith.constant 0 : index
    %0 = vector.load %arg0[%c0, %c0_0] : memref<8x256xf32, #tpu.memory_space<vmem>>, vector<8x256xf32>
    %c0_1 = arith.constant 0 : index
    %c0_2 = arith.constant 0 : index
    %1 = vector.load %arg1[%c0_1, %c0_2] : memref<256x32xf32, #tpu.memory_space<vmem>>, vector<256x32xf32>
    %cst = arith.constant dense<0.000000e+00> : vector<8x32xf32>
    %2 = tpu.matmul %0, %1, %cst {dimension_numbers = #tpu.dot_dimension_numbers<[1], [0], [0], [1], [0, 0, 1, 1], [], []>} : vector<8x256xf32>, vector<256x32xf32>, vector<8x32xf32> -> vector<8x32xf32>
    %c0_3 = arith.constant 0 : index
    %c0_4 = arith.constant 0 : index
    %3 = vector.load %arg2[%c0_3, %c0_4] : memref<1x32xf32, #tpu.memory_space<vmem>>, vector<1x32xf32>
    %4 = vector.broadcast %3 : vector<1x32xf32> to vector<8x32xf32>
    %5 = arith.addf %2, %4 : vector<8x32xf32>
    %cst_5 = arith.constant 0.000000e+00 : f32
    %6 = vector.broadcast %cst_5 : f32 to vector<8x32xf32>
    %7 = arith.maximumf %5, %6 : vector<8x32xf32>
    %c0_6 = arith.constant 0 : index
    %c0_7 = arith.constant 0 : index
    %8 = vector.load %arg3[%c0_6, %c0_7] : memref<8x32xf32, #tpu.memory_space<vmem>>, vector<8x32xf32>
    tpu.vector_store %arg3[%c0_6, %c0_7], %7 {strides = array<i32>} : memref<8x32xf32, #tpu.memory_space<vmem>>, vector<8x32xf32>,
    return
  }
}

module attributes {stable_mosaic.version = 11 : i64} {
  func.func @_latent_kernel(%arg0: memref<2x128xf32, #tpu.memory_space<vmem>>, %arg1: memref<128x16xf32, #tpu.memory_space<vmem>>, %arg2: memref<1x16xf32, #tpu.memory_space<vmem>>, %arg3: memref<16x128xf32, #tpu.memory_space<vmem>>, %arg4: memref<1x128xf32, #tpu.memory_space<vmem>>, %arg5: memref<2x16xf32, #tpu.memory_space<vmem>>, %arg6: memref<2x128xf32, #tpu.memory_space<vmem>>) attributes {dimension_semantics = [], scalar_prefetch = 0 : i64, scratch_operands = 0 : i64, tpu.core_type = #tpu.core_type<tc>} {
    %c0 = arith.constant 0 : index
    %c0_0 = arith.constant 0 : index
    %0 = vector.load %arg0[%c0, %c0_0] : memref<2x128xf32, #tpu.memory_space<vmem>>, vector<2x128xf32>
    %c0_1 = arith.constant 0 : index
    %c0_2 = arith.constant 0 : index
    %1 = vector.load %arg1[%c0_1, %c0_2] : memref<128x16xf32, #tpu.memory_space<vmem>>, vector<128x16xf32>
    %cst = arith.constant dense<0.000000e+00> : vector<2x16xf32>
    %2 = tpu.matmul %0, %1, %cst {dimension_numbers = #tpu.dot_dimension_numbers<[1], [0], [0], [1], [0, 0, 1, 1], [], []>} : vector<2x128xf32>, vector<128x16xf32>, vector<2x16xf32> -> vector<2x16xf32>
    %c0_3 = arith.constant 0 : index
    %c0_4 = arith.constant 0 : index
    %3 = vector.load %arg2[%c0_3, %c0_4] : memref<1x16xf32, #tpu.memory_space<vmem>>, vector<1x16xf32>
    %4 = vector.broadcast %3 : vector<1x16xf32> to vector<2x16xf32>
    %5 = arith.addf %2, %4 : vector<2x16xf32>
    %c0_5 = arith.constant 0 : index
    %c0_6 = arith.constant 0 : index
    %6 = vector.load %arg5[%c0_5, %c0_6] : memref<2x16xf32, #tpu.memory_space<vmem>>, vector<2x16xf32>
    tpu.vector_store %arg5[%c0_5, %c0_6], %5 {strides = array<i32>} : memref<2x16xf32, #tpu.memory_space<vmem>>, vector<2x16xf32>,
    %c0_7 = arith.constant 0 : index
    %c0_8 = arith.constant 0 : index
    %7 = vector.load %arg3[%c0_7, %c0_8] : memref<16x128xf32, #tpu.memory_space<vmem>>, vector<16x128xf32>
    %cst_9 = arith.constant dense<0.000000e+00> : vector<2x128xf32>
    %8 = tpu.matmul %5, %7, %cst_9 {dimension_numbers = #tpu.dot_dimension_numbers<[1], [0], [0], [1], [0, 0, 1, 1], [], []>} : vector<2x16xf32>, vector<16x128xf32>, vector<2x128xf32> -> vector<2x128xf32>
    %c0_10 = arith.constant 0 : index
    %c0_11 = arith.constant 0 : index
    %9 = vector.load %arg4[%c0_10, %c0_11] : memref<1x128xf32, #tpu.memory_space<vmem>>, vector<1x128xf32>
    %10 = vector.broadcast %9 : vector<1x128xf32> to vector<2x128xf32>
    %11 = arith.addf %8, %10 : vector<2x128xf32>
    %cst_12 = arith.constant 0.000000e+00 : f32
    %12 = vector.broadcast %cst_12 : f32 to vector<2x128xf32>
    %13 = arith.maximumf %11, %12 : vector<2x128xf32>
    %c0_13 = arith.constant 0 : index
    %c0_14 = arith.constant 0 : index
    %14 = vector.load %arg6[%c0_13, %c0_14] : memref<2x128xf32, #tpu.memory_space<vmem>>, vector<2x128xf32>
    tpu.vector_store %arg6[%c0_13, %c0_14], %13 {strides = array<i32>} : memref<2x128xf32, #tpu.memory_space<vmem>>, vector<2x128xf32>,
    return
  }
}

module attributes {stable_mosaic.version = 11 : i64} {
  func.func @kernel(%arg0: memref<18x128xf32, #tpu.memory_space<vmem>>, %arg1: memref<128x64xf32, #tpu.memory_space<vmem>>, %arg2: memref<1x64xf32, #tpu.memory_space<vmem>>, %arg3: memref<18x64xf32, #tpu.memory_space<vmem>>) attributes {dimension_semantics = [], scalar_prefetch = 0 : i64, scratch_operands = 0 : i64, tpu.core_type = #tpu.core_type<tc>} {
    %c0 = arith.constant 0 : index
    %c0_0 = arith.constant 0 : index
    %0 = vector.load %arg0[%c0, %c0_0] : memref<18x128xf32, #tpu.memory_space<vmem>>, vector<18x128xf32>
    %c0_1 = arith.constant 0 : index
    %c0_2 = arith.constant 0 : index
    %1 = vector.load %arg1[%c0_1, %c0_2] : memref<128x64xf32, #tpu.memory_space<vmem>>, vector<128x64xf32>
    %cst = arith.constant dense<0.000000e+00> : vector<18x64xf32>
    %2 = tpu.matmul %0, %1, %cst {dimension_numbers = #tpu.dot_dimension_numbers<[1], [0], [0], [1], [0, 0, 1, 1], [], []>} : vector<18x128xf32>, vector<128x64xf32>, vector<18x64xf32> -> vector<18x64xf32>
    %c0_3 = arith.constant 0 : index
    %c0_4 = arith.constant 0 : index
    %3 = vector.load %arg2[%c0_3, %c0_4] : memref<1x64xf32, #tpu.memory_space<vmem>>, vector<1x64xf32>
    %4 = vector.broadcast %3 : vector<1x64xf32> to vector<18x64xf32>
    %5 = arith.addf %2, %4 : vector<18x64xf32>
    %cst_5 = arith.constant 0.000000e+00 : f32
    %6 = vector.broadcast %cst_5 : f32 to vector<18x64xf32>
    %7 = arith.maximumf %5, %6 : vector<18x64xf32>
    %c0_6 = arith.constant 0 : index
    %c0_7 = arith.constant 0 : index
    %8 = vector.load %arg3[%c0_6, %c0_7] : memref<18x64xf32, #tpu.memory_space<vmem>>, vector<18x64xf32>
    tpu.vector_store %arg3[%c0_6, %c0_7], %7 {strides = array<i32>} : memref<18x64xf32, #tpu.memory_space<vmem>>, vector<18x64xf32>,
    return
  }
}

module attributes {stable_mosaic.version = 11 : i64} {
  func.func @kernel(%arg0: memref<50x64xf32, #tpu.memory_space<vmem>>, %arg1: memref<64x32xf32, #tpu.memory_space<vmem>>, %arg2: memref<1x32xf32, #tpu.memory_space<vmem>>, %arg3: memref<50x32xf32, #tpu.memory_space<vmem>>) attributes {dimension_semantics = [], scalar_prefetch = 0 : i64, scratch_operands = 0 : i64, tpu.core_type = #tpu.core_type<tc>} {
    %c0 = arith.constant 0 : index
    %c0_0 = arith.constant 0 : index
    %0 = vector.load %arg0[%c0, %c0_0] : memref<50x64xf32, #tpu.memory_space<vmem>>, vector<50x64xf32>
    %c0_1 = arith.constant 0 : index
    %c0_2 = arith.constant 0 : index
    %1 = vector.load %arg1[%c0_1, %c0_2] : memref<64x32xf32, #tpu.memory_space<vmem>>, vector<64x32xf32>
    %cst = arith.constant dense<0.000000e+00> : vector<50x32xf32>
    %2 = tpu.matmul %0, %1, %cst {dimension_numbers = #tpu.dot_dimension_numbers<[1], [0], [0], [1], [0, 0, 1, 1], [], []>} : vector<50x64xf32>, vector<64x32xf32>, vector<50x32xf32> -> vector<50x32xf32>
    %c0_3 = arith.constant 0 : index
    %c0_4 = arith.constant 0 : index
    %3 = vector.load %arg2[%c0_3, %c0_4] : memref<1x32xf32, #tpu.memory_space<vmem>>, vector<1x32xf32>
    %4 = vector.broadcast %3 : vector<1x32xf32> to vector<50x32xf32>
    %5 = arith.addf %2, %4 : vector<50x32xf32>
    %cst_5 = arith.constant 0.000000e+00 : f32
    %6 = vector.broadcast %cst_5 : f32 to vector<50x32xf32>
    %7 = arith.maximumf %5, %6 : vector<50x32xf32>
    %c0_6 = arith.constant 0 : index
    %c0_7 = arith.constant 0 : index
    %8 = vector.load %arg3[%c0_6, %c0_7] : memref<50x32xf32, #tpu.memory_space<vmem>>, vector<50x32xf32>
    tpu.vector_store %arg3[%c0_6, %c0_7], %7 {strides = array<i32>} : memref<50x32xf32, #tpu.memory_space<vmem>>, vector<50x32xf32>,
    return
  }
}

module attributes {stable_mosaic.version = 11 : i64} {
  func.func @kernel(%arg0: memref<162x32xf32, #tpu.memory_space<vmem>>, %arg1: memref<32x4xf32, #tpu.memory_space<vmem>>, %arg2: memref<1x4xf32, #tpu.memory_space<vmem>>, %arg3: memref<162x4xf32, #tpu.memory_space<vmem>>) attributes {dimension_semantics = [], scalar_prefetch = 0 : i64, scratch_operands = 0 : i64, tpu.core_type = #tpu.core_type<tc>} {
    %c0 = arith.constant 0 : index
    %c0_0 = arith.constant 0 : index
    %0 = vector.load %arg0[%c0, %c0_0] : memref<162x32xf32, #tpu.memory_space<vmem>>, vector<162x32xf32>
    %c0_1 = arith.constant 0 : index
    %c0_2 = arith.constant 0 : index
    %1 = vector.load %arg1[%c0_1, %c0_2] : memref<32x4xf32, #tpu.memory_space<vmem>>, vector<32x4xf32>
    %cst = arith.constant dense<0.000000e+00> : vector<162x4xf32>
    %2 = tpu.matmul %0, %1, %cst {dimension_numbers = #tpu.dot_dimension_numbers<[1], [0], [0], [1], [0, 0, 1, 1], [], []>} : vector<162x32xf32>, vector<32x4xf32>, vector<162x4xf32> -> vector<162x4xf32>
    %c0_3 = arith.constant 0 : index
    %c0_4 = arith.constant 0 : index
    %3 = vector.load %arg2[%c0_3, %c0_4] : memref<1x4xf32, #tpu.memory_space<vmem>>, vector<1x4xf32>
    %4 = vector.broadcast %3 : vector<1x4xf32> to vector<162x4xf32>
    %5 = arith.addf %2, %4 : vector<162x4xf32>
    %6 = arith.negf %5 : vector<162x4xf32>
    %7 = math.exp %6 : vector<162x4xf32>
    %cst_5 = arith.constant 1.000000e+00 : f32
    %8 = vector.broadcast %cst_5 : f32 to vector<162x4xf32>
    %9 = arith.addf %8, %7 : vector<162x4xf32>
    %10 = arith.divf %8, %9 : vector<162x4xf32>
    %c0_6 = arith.constant 0 : index
    %c0_7 = arith.constant 0 : index
    %11 = vector.load %arg3[%c0_6, %c0_7] : memref<162x4xf32, #tpu.memory_space<vmem>>, vector<162x4xf32>
    tpu.vector_store %arg3[%c0_6, %c0_7], %10 {strides = array<i32>} : memref<162x4xf32, #tpu.memory_space<vmem>>, vector<162x4xf32>,
    return
  }
}

</mosaic_0001>

<bundles_post_ra>
// kernel: vanilla_conv_ae_forward.7
= control target key start
LH: loop header
LB: loop body
LE: loop exit
PB: predicated region body
PF: predicated region fallthrough
CT: control target
= control target key end

     0   :  { %vm39_vm0 = vcmask 130048   ;;  %vm249_vm1 = vcmask 64512   ;;  %s496_s1 = inlined_call_operand.vmem [shape: f32[16,8], index: 1, kind: input, shape index: {}]   ;;  %s497_s0 = inlined_call_operand.vmem [shape: f32[128,16], index: 0, kind: input, shape index: {}]   ;;  %s498_s2 = inlined_call_operand.vmem [shape: f32[1,8], index: 2, kind: input, shape index: {}]   ;;  %s499_s3 = inlined_call_operand.vmem [shape: f32[128,8], index: 3, kind: output, shape index: {}]  }
   0x1   :  { %v30_v0 = vld [vmem:[%s496_s1] sm:$0xff]  ;;  %v31_v1 = vld [vmem:[%s496_s1 + $0x8] sm:$0xff]  ;;  %v16_v7 = vld [vmem:[%s497_s0 + $0x10] sm:$0xff] }
   0x2   :  { %v14_v2 = vld [vmem:[%s497_s0] sm:$0xff]  ;;  %v333_v3 = vpack.c.bf16 %v31_v1, %v30_v0  ;;  %v15_v5 = vld [vmem:[%s497_s0 + $0x8] sm:$0xff]  ;;  %v24_v8 = vld [vmem:[%s497_s0 + $0x50] sm:$0xff] }
   0x3   :  { %309 = vmatprep.mubr.msk.f32.mxu0 %vm39_vm0, %v14_v2  ;;  %v22_v4 = vld [vmem:[%s497_s0 + $0x40] sm:$0xff]  ;;  %v23_v6 = vld [vmem:[%s497_s0 + $0x48] sm:$0xff]  ;;  %v17_v9 = vld [vmem:[%s497_s0 + $0x18] sm:$0xff] }
   0x4   :  { %321 = vmatprep.mubr.msk.f32.mxu1 %vm39_vm0, %v22_v4  ;;  %334 = vmatprep.subr.bf16.mxu0 %v333_v3  ;;  %v25_v10 = vld [vmem:[%s497_s0 + $0x58] sm:$0xff]  ;;  %v18_v11 = vld [vmem:[%s497_s0 + $0x20] sm:$0xff]  ;;  %v19_v13 = vld [vmem:[%s497_s0 + $0x28] sm:$0xff] }
   0x5   :  { %337 = vmatprep.subr.bf16.mxu1 %v333_v3  ;;  %336 = vmatpush3.bf16.msra.mxu0 %v333_v3  ;;  %v26_v12 = vld [vmem:[%s497_s0 + $0x60] sm:$0xff]  ;;  %v27_v14 = vld [vmem:[%s497_s0 + $0x68] sm:$0xff]  ;;  %v20_v15 = vld [vmem:[%s497_s0 + $0x30] sm:$0xff] }
   0x6   :  { %338 = vmatpush3.bf16.msra.mxu1 %v333_v3  ;;  %v28_v16 = vld [vmem:[%s497_s0 + $0x70] sm:$0xff]  ;;  %v21_v17 = vld [vmem:[%s497_s0 + $0x38] sm:$0xff]  ;;  %v270_v19 = vld [vmem:[%s498_s2] ss:$0 sm:$0xff] }
   0x7   :  { %v29_v18 = vld [vmem:[%s497_s0 + $0x78] sm:$0xff] }
   0x8   :  { %310 = vmatmul.mubr.msk.f32.vlgmr.msra.gmra.mrb[0].mxu0 %vm39_vm0, %v15_v5 }
   0x9   :  { %322 = vmatmul.mubr.msk.f32.vlgmr.msra.gmra.mrb[0].mxu1 %vm39_vm0, %v23_v6  ;;  %312 = vmatprep.mubr.msk.f32.mxu0 %vm39_vm0, %v16_v7 }
   0xa   :  { %324 = vmatprep.mubr.msk.f32.mxu1 %vm39_vm0, %v24_v8 }
   0xc   :  { %313 = vmatmul.mubr.msk.f32.gmra.mrb[2].mxu0 %vm39_vm0, %v17_v9 }
   0xd   :  { %325 = vmatmul.mubr.msk.f32.gmra.mrb[2].mxu1 %vm39_vm0, %v25_v10  ;;  %315 = vmatprep.mubr.msk.f32.mxu0 %vm39_vm0, %v18_v11 }
   0xe   :  { %327 = vmatprep.mubr.msk.f32.mxu1 %vm39_vm0, %v26_v12 }
  0x10   :  { %316 = vmatmul.mubr.msk.f32.gmra.mrb[4].mxu0 %vm39_vm0, %v19_v13 }
  0x11   :  { %328 = vmatmul.mubr.msk.f32.gmra.mrb[4].mxu1 %vm39_vm0, %v27_v14  ;;  %318 = vmatprep.mubr.msk.f32.mxu0 %vm39_vm0, %v20_v15 }
  0x12   :  { %330 = vmatprep.mubr.msk.f32.mxu1 %vm39_vm0, %v28_v16 }
  0x14   :  { %319 = vmatmul.mubr.msk.f32.gmra.mrb[6].mxu0 %vm39_vm0, %v21_v17 }
  0x15   :  { %331 = vmatmul.mubr.msk.f32.gmra.mrb[6].mxu1 %vm39_vm0, %v29_v18 }
  0xdb   :  { %v311_v20 = vpop.f32.mrb[0].mxu0 }
  0xdc   :  { %v323_v21 = vpop.f32.mrb[0].mxu1  ;;  %v160_v22 = vadd.f32 %v311_v20, %v270_v19  ;;  %v154_v24 = vpop.f32.mrb[1].mxu0 }
  0xdd   :  { %v200_v23 = vadd.f32 %v323_v21, %v270_v19  ;;  %v194_v25 = vpop.f32.mrb[1].mxu1  ;;  %v155_v26 = vadd.f32 %v270_v19, %v154_v24 }
  0xde   :  { %v195_v27 = vadd.f32 %v270_v19, %v194_v25  ;;  %v234_v28 = vmax.f32 %v160_v22, 0.0 }
  0xdf   :  { %v242_v29 = vmax.f32 %v200_v23, 0.0  ;;  %v233_v30 = vmax.f32 %v155_v26, 0.0  ;;  %v314_v32 = vpop.f32.mrb[2].mxu0 }
  0xe0   :  { %v241_v31 = vmax.f32 %v195_v27, 0.0  ;;  %v326_v33 = vpop.f32.mrb[2].mxu1  ;;  %251 = vst.msk [vmem:[%s499_s3 + $0x8] sm:$0xff] %vm249_vm1, %v234_v28  ;;  %v170_v34 = vadd.f32 %v314_v32, %v270_v19  ;;  %v164_v36 = vpop.f32.mrb[3].mxu0 }
  0xe1   :  { %259 = vst.msk [vmem:[%s499_s3 + $0x48] sm:$0xff] %vm249_vm1, %v242_v29  ;;  %v210_v35 = vadd.f32 %v326_v33, %v270_v19  ;;  %v204_v37 = vpop.f32.mrb[3].mxu1  ;;  %250 = vst.msk [vmem:[%s499_s3] sm:$0xff] %vm249_vm1, %v233_v30  ;;  %v165_v38 = vadd.f32 %v270_v19, %v164_v36 }
  0xe2   :  { %258 = vst.msk [vmem:[%s499_s3 + $0x40] sm:$0xff] %vm249_vm1, %v241_v31  ;;  %v205_v39 = vadd.f32 %v270_v19, %v204_v37  ;;  %v236_v40 = vmax.f32 %v170_v34, 0.0 }
  0xe3   :  { %v244_v41 = vmax.f32 %v210_v35, 0.0  ;;  %v235_v42 = vmax.f32 %v165_v38, 0.0  ;;  %v317_v44 = vpop.f32.mrb[4].mxu0 }
  0xe4   :  { %v243_v43 = vmax.f32 %v205_v39, 0.0  ;;  %v329_v45 = vpop.f32.mrb[4].mxu1  ;;  %253 = vst.msk [vmem:[%s499_s3 + $0x18] sm:$0xff] %vm249_vm1, %v236_v40  ;;  %v180_v46 = vadd.f32 %v317_v44, %v270_v19  ;;  %v174_v48 = vpop.f32.mrb[5].mxu0 }
  0xe5   :  { %261 = vst.msk [vmem:[%s499_s3 + $0x58] sm:$0xff] %vm249_vm1, %v244_v41  ;;  %v220_v47 = vadd.f32 %v329_v45, %v270_v19  ;;  %v214_v49 = vpop.f32.mrb[5].mxu1  ;;  %252 = vst.msk [vmem:[%s499_s3 + $0x10] sm:$0xff] %vm249_vm1, %v235_v42  ;;  %v175_v50 = vadd.f32 %v270_v19, %v174_v48 }
  0xe6   :  { %260 = vst.msk [vmem:[%s499_s3 + $0x50] sm:$0xff] %vm249_vm1, %v243_v43  ;;  %v215_v51 = vadd.f32 %v270_v19, %v214_v49  ;;  %v238_v52 = vmax.f32 %v180_v46, 0.0 }
  0xe7   :  { %v246_v53 = vmax.f32 %v220_v47, 0.0  ;;  %v237_v54 = vmax.f32 %v175_v50, 0.0  ;;  %v320_v56 = vpop.f32.mrb[6].mxu0 }
  0xe8   :  { %v245_v55 = vmax.f32 %v215_v51, 0.0  ;;  %v332_v57 = vpop.f32.mrb[6].mxu1  ;;  %255 = vst.msk [vmem:[%s499_s3 + $0x28] sm:$0xff] %vm249_vm1, %v238_v52  ;;  %v190_v58 = vadd.f32 %v320_v56, %v270_v19  ;;  %v184_v60 = vpop.f32.mrb[7].mxu0 }
  0xe9   :  { %263 = vst.msk [vmem:[%s499_s3 + $0x68] sm:$0xff] %vm249_vm1, %v246_v53  ;;  %v230_v59 = vadd.f32 %v332_v57, %v270_v19  ;;  %v224_v61 = vpop.f32.mrb[7].mxu1  ;;  %254 = vst.msk [vmem:[%s499_s3 + $0x20] sm:$0xff] %vm249_vm1, %v237_v54  ;;  %v185_v62 = vadd.f32 %v270_v19, %v184_v60 }
  0xea   :  { %262 = vst.msk [vmem:[%s499_s3 + $0x60] sm:$0xff] %vm249_vm1, %v245_v55  ;;  %v225_v63 = vadd.f32 %v270_v19, %v224_v61  ;;  %v240_v0 = vmax.f32 %v190_v58, 0.0 }
  0xeb   :  { %v248_v1 = vmax.f32 %v230_v59, 0.0  ;;  %v239_v2 = vmax.f32 %v185_v62, 0.0 }
  0xec   :  { %v247_v3 = vmax.f32 %v225_v63, 0.0  ;;  %257 = vst.msk [vmem:[%s499_s3 + $0x38] sm:$0xff] %vm249_vm1, %v240_v0 }
  0xed   :  { %265 = vst.msk [vmem:[%s499_s3 + $0x78] sm:$0xff] %vm249_vm1, %v248_v1  ;;  %256 = vst.msk [vmem:[%s499_s3 + $0x30] sm:$0xff] %vm249_vm1, %v239_v2 }
  0xee   :  { %264 = vst.msk [vmem:[%s499_s3 + $0x70] sm:$0xff] %vm249_vm1, %v247_v3 }

// kernel: vanilla_conv_ae_forward.8
= control target key start
LH: loop header
LB: loop body
LE: loop exit
PB: predicated region body
PF: predicated region fallthrough
CT: control target
= control target key end

     0   :  { %vm130_vm0 = vcmask 130048   ;;  %s341_s1 = inlined_call_operand.vmem [shape: f32[128,16], index: 1, kind: input, shape index: {}]   ;;  %s342_s0 = inlined_call_operand.vmem [shape: f32[32,128], index: 0, kind: input, shape index: {}]   ;;  %s343_s2 = inlined_call_operand.vmem [shape: f32[1,16], index: 2, kind: input, shape index: {}]   ;;  %s344_s3 = inlined_call_operand.vmem [shape: f32[32,16], index: 3, kind: output, shape index: {}]  }
   0x1   :  { %v18_v0 = vld [vmem:[%s341_s1] sm:$0xff]  ;;  %v19_v1 = vld [vmem:[%s341_s1 + $0x8] sm:$0xff]  ;;  %v20_v2 = vld [vmem:[%s341_s1 + $0x10] sm:$0xff] }
   0x2   :  { %v198_v3 = vpack.c.bf16 %v19_v1, %v18_v0  ;;  %v21_v4 = vld [vmem:[%s341_s1 + $0x18] sm:$0xff]  ;;  %v22_v6 = vld [vmem:[%s341_s1 + $0x20] sm:$0xff]  ;;  %v23_v7 = vld [vmem:[%s341_s1 + $0x28] sm:$0xff] }
   0x3   :  { %v202_v5 = vpack.c.bf16 %v21_v4, %v20_v2  ;;  %v206_v8 = vpack.c.bf16 %v23_v7, %v22_v6  ;;  %v14_v9 = vld [vmem:[%s342_s0] sm:$0xff]  ;;  %v16_v10 = vld [vmem:[%s342_s0 + $0x10] sm:$0xff]  ;;  %v25_v12 = vld [vmem:[%s341_s1 + $0x38] sm:$0xff] }
   0x4   :  { %199 = vmatprep.subr.bf16.mxu0 %v198_v3  ;;  %230 = vmatprep.subr.bf16.mxu1 %v198_v3  ;;  %v24_v11 = vld [vmem:[%s341_s1 + $0x30] sm:$0xff]  ;;  %v26_v14 = vld [vmem:[%s341_s1 + $0x40] sm:$0xff]  ;;  %v27_v15 = vld [vmem:[%s341_s1 + $0x48] sm:$0xff] }
   0x5   :  { %201 = vmatpush3.bf16.msra.mxu0 %v198_v3  ;;  %238 = vmatpush3.bf16.msra.mxu1 %v198_v3  ;;  %v210_v13 = vpack.c.bf16 %v25_v12, %v24_v11  ;;  %v214_v16 = vpack.c.bf16 %v27_v15, %v26_v14  ;;  %v28_v17 = vld [vmem:[%s341_s1 + $0x50] sm:$0xff]  ;;  %v29_v18 = vld [vmem:[%s341_s1 + $0x58] sm:$0xff]  ;;  %v30_v20 = vld [vmem:[%s341_s1 + $0x60] sm:$0xff] }
   0x6   :  { %203 = vmatprep.subr.bf16.mxu0 %v202_v5  ;;  %231 = vmatprep.subr.bf16.mxu1 %v202_v5  ;;  %v218_v19 = vpack.c.bf16 %v29_v18, %v28_v17  ;;  %v31_v21 = vld [vmem:[%s341_s1 + $0x68] sm:$0xff]  ;;  %v32_v23 = vld [vmem:[%s341_s1 + $0x70] sm:$0xff]  ;;  %v33_v24 = vld [vmem:[%s341_s1 + $0x78] sm:$0xff] }
   0x7   :  { %192 = vmatprep.mubr.f32.mxu0 %v14_v9  ;;  %195 = vmatprep.mubr.f32.mxu1 %v16_v10  ;;  %v222_v22 = vpack.c.bf16 %v31_v21, %v30_v20  ;;  %v226_v25 = vpack.c.bf16 %v33_v24, %v32_v23  ;;  %v15_v26 = vld [vmem:[%s342_s0 + $0x8] sm:$0xff]  ;;  %v17_v27 = vld [vmem:[%s342_s0 + $0x18] sm:$0xff]  ;;  %v139_v28 = vld [vmem:[%s343_s2] ss:$0 sm:$0xff] }
   0x9   :  { %205 = vmatpush3.bf16.msra.mxu0 %v202_v5  ;;  %239 = vmatpush3.bf16.msra.mxu1 %v202_v5 }
   0xa   :  { %207 = vmatprep.subr.bf16.mxu0 %v206_v8  ;;  %232 = vmatprep.subr.bf16.mxu1 %v206_v8 }
   0xd   :  { %209 = vmatpush3.bf16.msra.mxu0 %v206_v8  ;;  %240 = vmatpush3.bf16.msra.mxu1 %v206_v8 }
   0xe   :  { %211 = vmatprep.subr.bf16.mxu0 %v210_v13  ;;  %233 = vmatprep.subr.bf16.mxu1 %v210_v13 }
  0x11   :  { %213 = vmatpush3.bf16.msra.mxu0 %v210_v13  ;;  %241 = vmatpush3.bf16.msra.mxu1 %v210_v13 }
  0x12   :  { %215 = vmatprep.subr.bf16.mxu0 %v214_v16  ;;  %234 = vmatprep.subr.bf16.mxu1 %v214_v16 }
  0x15   :  { %217 = vmatpush3.bf16.msra.mxu0 %v214_v16  ;;  %242 = vmatpush3.bf16.msra.mxu1 %v214_v16 }
  0x16   :  { %219 = vmatprep.subr.bf16.mxu0 %v218_v19  ;;  %235 = vmatprep.subr.bf16.mxu1 %v218_v19 }
  0x19   :  { %221 = vmatpush3.bf16.msra.mxu0 %v218_v19  ;;  %243 = vmatpush3.bf16.msra.mxu1 %v218_v19 }
  0x1a   :  { %223 = vmatprep.subr.bf16.mxu0 %v222_v22  ;;  %236 = vmatprep.subr.bf16.mxu1 %v222_v22 }
  0x1d   :  { %225 = vmatpush3.bf16.msra.mxu0 %v222_v22  ;;  %244 = vmatpush3.bf16.msra.mxu1 %v222_v22 }
  0x1e   :  { %227 = vmatprep.subr.bf16.mxu0 %v226_v25  ;;  %237 = vmatprep.subr.bf16.mxu1 %v226_v25 }
  0x21   :  { %229 = vmatpush3.bf16.msra.mxu0 %v226_v25  ;;  %245 = vmatpush3.bf16.msra.mxu1 %v226_v25 }
  0x24   :  { %193 = vmatmul.mubr.f32.vlgmr.msra.gmra.mrb[0].mxu0 %v15_v26  ;;  %196 = vmatmul.mubr.f32.vlgmr.msra.gmra.mrb[0].mxu1 %v17_v27 }
  0xf7   :  { %v194_v29 = vpop.f32.mrb[0].mxu0  ;;  %v197_v30 = vpop.f32.mrb[0].mxu1 }
  0xf8   :  { %v113_v31 = vadd.f32 %v194_v29, %v139_v28  ;;  %v123_v32 = vadd.f32 %v197_v30, %v139_v28  ;;  %v107_v33 = vpop.f32.mrb[1].mxu0  ;;  %v117_v34 = vpop.f32.mrb[1].mxu1 }
  0xf9   :  { %v108_v35 = vadd.f32 %v139_v28, %v107_v33  ;;  %v118_v36 = vadd.f32 %v139_v28, %v117_v34 }
  0xfa   :  { %v127_v37 = vmax.f32 %v113_v31, 0.0  ;;  %v129_v38 = vmax.f32 %v123_v32, 0.0 }
  0xfb   :  { %v126_v39 = vmax.f32 %v108_v35, 0.0  ;;  %v128_v40 = vmax.f32 %v118_v36, 0.0 }
  0xfc   :  { %132 = vst.msk [vmem:[%s344_s3 + $0x8] sm:$0xff] %vm130_vm0, %v127_v37  ;;  %134 = vst.msk [vmem:[%s344_s3 + $0x18] sm:$0xff] %vm130_vm0, %v129_v38 }
  0xfd   :  { %131 = vst.msk [vmem:[%s344_s3] sm:$0xff] %vm130_vm0, %v126_v39  ;;  %133 = vst.msk [vmem:[%s344_s3 + $0x10] sm:$0xff] %vm130_vm0, %v128_v40 }

// kernel: vanilla_conv_ae_forward.9
= control target key start
LH: loop header
LB: loop body
LE: loop exit
PB: predicated region body
PF: predicated region fallthrough
CT: control target
= control target key end

     0   :  { %vm126_vm0 = vcmask 261120   ;;  %s328_s1 = inlined_call_operand.vmem [shape: f32[256,32], index: 1, kind: input, shape index: {}]   ;;  %s329_s0 = inlined_call_operand.vmem [shape: f32[8,256], index: 0, kind: input, shape index: {}]   ;;  %s330_s2 = inlined_call_operand.vmem [shape: f32[1,32], index: 2, kind: input, shape index: {}]   ;;  %s331_s3 = inlined_call_operand.vmem [shape: f32[8,32], index: 3, kind: output, shape index: {}]  }
   0x1   :  { %v32_v0 = vld [vmem:[%s328_s1 + $0x80] sm:$0xff]  ;;  %v33_v1 = vld [vmem:[%s328_s1 + $0x88] sm:$0xff]  ;;  %v34_v5 = vld [vmem:[%s328_s1 + $0x90] sm:$0xff] }
   0x2   :  { %v16_v2 = vld [vmem:[%s328_s1] sm:$0xff]  ;;  %v168_v3 = vpack.c.bf16 %v33_v1, %v32_v0  ;;  %v17_v4 = vld [vmem:[%s328_s1 + $0x8] sm:$0xff]  ;;  %v35_v6 = vld [vmem:[%s328_s1 + $0x98] sm:$0xff] }
   0x3   :  { %v170_v7 = vpack.c.bf16 %v17_v4, %v16_v2  ;;  %v172_v8 = vpack.c.bf16 %v35_v6, %v34_v5  ;;  %v18_v9 = vld [vmem:[%s328_s1 + $0x10] sm:$0xff]  ;;  %v19_v10 = vld [vmem:[%s328_s1 + $0x18] sm:$0xff]  ;;  %v36_v11 = vld [vmem:[%s328_s1 + $0xa0] sm:$0xff] }
   0x4   :  { %169 = vmatprep.subr.bf16.mxu0 %v168_v3  ;;  %v37_v12 = vld [vmem:[%s328_s1 + $0xa8] sm:$0xff]  ;;  %v174_v13 = vpack.c.bf16 %v19_v10, %v18_v9  ;;  %v20_v15 = vld [vmem:[%s328_s1 + $0x20] sm:$0xff]  ;;  %v38_v17 = vld [vmem:[%s328_s1 + $0xb0] sm:$0xff] }
   0x5   :  { %171 = vmatpush3.bf16.msra.mxu0 %v170_v7  ;;  %v176_v14 = vpack.c.bf16 %v37_v12, %v36_v11  ;;  %v21_v16 = vld [vmem:[%s328_s1 + $0x28] sm:$0xff]  ;;  %v39_v18 = vld [vmem:[%s328_s1 + $0xb8] sm:$0xff]  ;;  %v22_v21 = vld [vmem:[%s328_s1 + $0x30] sm:$0xff] }
   0x6   :  { %173 = vmatprep.subr.bf16.mxu0 %v172_v8  ;;  %v178_v19 = vpack.c.bf16 %v21_v16, %v20_v15  ;;  %v180_v20 = vpack.c.bf16 %v39_v18, %v38_v17  ;;  %v23_v22 = vld [vmem:[%s328_s1 + $0x38] sm:$0xff]  ;;  %v40_v23 = vld [vmem:[%s328_s1 + $0xc0] sm:$0xff]  ;;  %v41_v24 = vld [vmem:[%s328_s1 + $0xc8] sm:$0xff] }
   0x7   :  { %v15_v25 = vld [vmem:[%s329_s0 + $0x8] sm:$0xff]  ;;  %v182_v26 = vpack.c.bf16 %v23_v22, %v22_v21  ;;  %v184_v27 = vpack.c.bf16 %v41_v24, %v40_v23  ;;  %v24_v28 = vld [vmem:[%s328_s1 + $0x40] sm:$0xff]  ;;  %v42_v30 = vld [vmem:[%s328_s1 + $0xd0] sm:$0xff] }
   0x8   :  { %119 = vmatprep.mubr.f32.mxu0 %v15_v25  ;;  %v25_v29 = vld [vmem:[%s328_s1 + $0x48] sm:$0xff]  ;;  %v43_v31 = vld [vmem:[%s328_s1 + $0xd8] sm:$0xff]  ;;  %v26_v34 = vld [vmem:[%s328_s1 + $0x50] sm:$0xff] }
   0x9   :  { %175 = vmatpush3.bf16.msra.mxu0 %v174_v13  ;;  %v186_v32 = vpack.c.bf16 %v25_v29, %v24_v28  ;;  %v188_v33 = vpack.c.bf16 %v43_v31, %v42_v30  ;;  %v27_v35 = vld [vmem:[%s328_s1 + $0x58] sm:$0xff]  ;;  %v44_v36 = vld [vmem:[%s328_s1 + $0xe0] sm:$0xff]  ;;  %v45_v37 = vld [vmem:[%s328_s1 + $0xe8] sm:$0xff] }
   0xa   :  { %177 = vmatprep.subr.bf16.mxu0 %v176_v14  ;;  %v190_v38 = vpack.c.bf16 %v27_v35, %v26_v34  ;;  %v192_v39 = vpack.c.bf16 %v45_v37, %v44_v36  ;;  %v28_v40 = vld [vmem:[%s328_s1 + $0x60] sm:$0xff]  ;;  %v29_v41 = vld [vmem:[%s328_s1 + $0x68] sm:$0xff]  ;;  %v46_v42 = vld [vmem:[%s328_s1 + $0xf0] sm:$0xff] }
   0xb   :  { %v47_v43 = vld [vmem:[%s328_s1 + $0xf8] sm:$0xff]  ;;  %v194_v44 = vpack.c.bf16 %v29_v41, %v28_v40  ;;  %v30_v46 = vld [vmem:[%s328_s1 + $0x70] sm:$0xff]  ;;  %v14_v49 = vld [vmem:[%s329_s0] sm:$0xff] }
   0xc   :  { %v196_v45 = vpack.c.bf16 %v47_v43, %v46_v42  ;;  %v31_v47 = vld [vmem:[%s328_s1 + $0x78] sm:$0xff]  ;;  %v132_v51 = vld [vmem:[%s330_s2] ss:$0 sm:$0xff] }
   0xd   :  { %179 = vmatpush3.bf16.msra.mxu0 %v178_v19  ;;  %v198_v48 = vpack.c.bf16 %v31_v47, %v30_v46 }
   0xe   :  { %181 = vmatprep.subr.bf16.mxu0 %v180_v20 }
  0x11   :  { %183 = vmatpush3.bf16.msra.mxu0 %v182_v26 }
  0x12   :  { %185 = vmatprep.subr.bf16.mxu0 %v184_v27 }
  0x15   :  { %187 = vmatpush3.bf16.msra.mxu0 %v186_v32 }
  0x16   :  { %189 = vmatprep.subr.bf16.mxu0 %v188_v33 }
  0x19   :  { %191 = vmatpush3.bf16.msra.mxu0 %v190_v38 }
  0x1a   :  { %193 = vmatprep.subr.bf16.mxu0 %v192_v39 }
  0x1d   :  { %195 = vmatpush3.bf16.msra.mxu0 %v194_v44 }
  0x1e   :  { %197 = vmatprep.subr.bf16.mxu0 %v196_v45 }
  0x21   :  { %199 = vmatpush3.bf16.msra.mxu0 %v198_v48 }
  0x24   :  { %120 = vmatmul.mubr.f32.vlgmr.msra.gmra.mrb[0].mxu0 %v14_v49 }
  0xf7   :  { %v165_v50 = vpop.f32.mrb[0].mxu0 }
  0xf8   :  { %v166_v52 = vpop.f32.mrb[1].mxu0 }
  0xf9   :  { %v167_v53 = vadd.f32 %v166_v52, %v165_v50 }
  0xfb   :  { %v122_v54 = vadd.f32 %v167_v53, %v132_v51 }
  0xfd   :  { %v125_v55 = vmax.f32 %v122_v54, 0.0 }
  0xff   :  { %127 = vst.msk [vmem:[%s331_s3] sm:$0xff] %vm126_vm0, %v125_v55 }

// kernel: vanilla_conv_ae_forward.10
= control target key start
LH: loop header
LB: loop body
LE: loop exit
PB: predicated region body
PF: predicated region fallthrough
CT: control target
= control target key end

     0   :  { %v342_v3 = vmov 0.0|0.0   ;;  %vm343_vm0 = vmmov 0   ;;  %v344_v6 = vmov 0.0   ;;  %s459_s0 = inlined_call_operand.vmem [shape: f32[2,128], index: 0, kind: input, shape index: {}]   ;;  %s460_s1 = inlined_call_operand.vmem [shape: f32[128,16], index: 1, kind: input, shape index: {}]   ;;  %s461_s2 = inlined_call_operand.vmem [shape: f32[1,16], index: 2, kind: input, shape index: {}]   ;;  %s462_s3 = inlined_call_operand.vmem [shape: f32[16,128], index: 3, kind: input, shape index: {}]   ;;  %s463_s4 = inlined_call_operand.vmem [shape: f32[1,128], index: 4, kind: input, shape index: {}]   ;;  %s464_s5 = inlined_call_operand.hbm [shape: f32[2,16], index: 5, kind: output, shape index: {0}]   ;;  %s465_s6 = inlined_call_operand.vmem [shape: f32[2,128], index: 6, kind: output, shape index: {1}]  }
   0x1   :  { %v24_v0 = vld [vmem:[%s460_s1] sm:$0xff]  ;;  %v25_v1 = vld [vmem:[%s460_s1 + $0x8] sm:$0xff]  ;;  %v26_v2 = vld [vmem:[%s460_s1 + $0x10] sm:$0xff]  ;;  %287 = vmatprep.subr.bf16.mxu0 %v342_v3  ;;  %277 = vmatprep.mubr.msk.f32.mxu0 %vm343_vm0, %v344_v6 }
   0x2   :  { %v288_v4 = vpack.c.bf16 %v25_v1, %v24_v0  ;;  %v27_v5 = vld [vmem:[%s460_s1 + $0x18] sm:$0xff]  ;;  %311 = vmatprep.subr.bf16.mxu1 %v342_v3  ;;  %284 = vmatprep.mubr.msk.f32.mxu1 %vm343_vm0, %v344_v6  ;;  %v28_v8 = vld [vmem:[%s460_s1 + $0x20] sm:$0xff]  ;;  %v29_v9 = vld [vmem:[%s460_s1 + $0x28] sm:$0xff] }
   0x3   :  { %v291_v7 = vpack.c.bf16 %v27_v5, %v26_v2 }
   0x4   :  { %289 = vmatpush3.bf16.msra.mxu0 %v288_v4 }
   0x5   :  { %290 = vmatprep.subr.bf16.mxu0 %v342_v3 }
   0x6   :  { %12 = vsyncpa [#allocation3], 0  ;;  %v294_v10 = vpack.c.bf16 %v29_v9, %v28_v8  ;;  %v30_v11 = vld [vmem:[%s460_s1 + $0x30] sm:$0xff]  ;;  %v31_v12 = vld [vmem:[%s460_s1 + $0x38] sm:$0xff]  ;;  %vm128_vm1 = vcmask 130048   ;;  %vm117_vm2 = vcmask 123904  }
   0x7   :  { %v297_v13 = vpack.c.bf16 %v31_v12, %v30_v11  ;;  %v32_v14 = vld [vmem:[%s460_s1 + $0x40] sm:$0xff]  ;;  %v33_v15 = vld [vmem:[%s460_s1 + $0x48] sm:$0xff]  ;;  %v34_v17 = vld [vmem:[%s460_s1 + $0x50] sm:$0xff] }
   0x8   :  { %292 = vmatpush3.bf16.msra.mxu0 %v291_v7  ;;  %v300_v16 = vpack.c.bf16 %v33_v15, %v32_v14  ;;  %v35_v18 = vld [vmem:[%s460_s1 + $0x58] sm:$0xff]  ;;  %v36_v20 = vld [vmem:[%s460_s1 + $0x60] sm:$0xff]  ;;  %v37_v21 = vld [vmem:[%s460_s1 + $0x68] sm:$0xff] }
   0x9   :  { %293 = vmatprep.subr.bf16.mxu0 %v342_v3  ;;  %v303_v19 = vpack.c.bf16 %v35_v18, %v34_v17  ;;  %v306_v22 = vpack.c.bf16 %v37_v21, %v36_v20  ;;  %v38_v23 = vld [vmem:[%s460_s1 + $0x70] sm:$0xff]  ;;  %v39_v24 = vld [vmem:[%s460_s1 + $0x78] sm:$0xff]  ;;  %v23_v26 = vld [vmem:[%s459_s0] sm:$0x3]  ;;  %s345_s0 = smov [#allocation2]  }
   0xa   :  { %v309_v25 = vpack.c.bf16 %v39_v24, %v38_v23  ;;  %v119_v27 = vld [vmem:[%s462_s3] sm:$0xff]  ;;  %v120_v28 = vld [vmem:[%s462_s3 + $0x8] sm:$0xff]  ;;  %s210_s12 = sshll.u32 %s345_s0, 4  ;;  %s211_s12 = int_to_ptr.vmem [resolvable:$true] %s210_s12 }
   0xb   :  { %v312_v29 = vpack.c.bf16 %v120_v28, %v119_v27  ;;  %v222_v30 = vld [vmem:[%s461_s2] ss:$0 sm:$0xff]  ;;  %s318_s13 = scalar_lea.vmem %s211_s12, 32  ;;  %p323_p1 = scmp.lt.s32.totalorder %s211_s12, %s211_s12 }
   0xc   :  { %295 = vmatpush3.bf16.msra.mxu0 %v294_v10  ;;  %p319_p0 = scmp.ne.s32.totalorder %s211_s12, %s318_s13  ;;  %p324_p2 = scmp.lt.s32.totalorder %s318_s13, %s318_s13 }
   0xd   :  { %296 = vmatprep.subr.bf16.mxu0 %v342_v3  ;;  %313 = vmatpush3.bf16.msra.mxu1 %v312_v29 }
   0xe   :  { %p325_p3 = por %p324_p2, %p323_p1 }
  0x10   :  { %298 = vmatpush3.bf16.msra.mxu0 %v297_v13  ;;  %p326_p4 = pnand %p325_p3, %p319_p0 }
  0x11   :  { %299 = vmatprep.subr.bf16.mxu0 %v342_v3 }
  0x14   :  { %301 = vmatpush3.bf16.msra.mxu0 %v300_v16 }
  0x15   :  { %302 = vmatprep.subr.bf16.mxu0 %v342_v3 }
  0x18   :  { %304 = vmatpush3.bf16.msra.mxu0 %v303_v19 }
  0x19   :  { %305 = vmatprep.subr.bf16.mxu0 %v342_v3 }
  0x1c   :  { %307 = vmatpush3.bf16.msra.mxu0 %v306_v22 }
  0x1d   :  { %308 = vmatprep.subr.bf16.mxu0 %v342_v3 }
  0x20   :  { %310 = vmatpush3.bf16.msra.mxu0 %v309_v25 }
  0x23   :  { %278 = vmatmul.mubr.f32.vlgmr.msra.gmra.mrb[0].mxu0 %v23_v26 }
  0xf6   :  { %v113_v31 = vpop.f32.mrb[0].mxu0 }
  0xf7   :  { %v114_v32 = vadd.f32 %v222_v30, %v113_v31  ;;  %v279_v33 = vpop.f32.mrb[1].mxu0 }
  0xf9   :  { %285 = vmatmul.mubr.msk.f32.vlgmr.msra.gmra.mrb[0].mxu1 %vm128_vm1, %v114_v32  ;;  %118 = vst.msk [vmem:[#allocation2] sm:$0x3] %vm117_vm2, %v114_v32 }
  0xfa   :  { %329 = shalt.err (!%p326_p4)
}
  0xfb   :  { %s330_s2 = scalar_lea.hbm %s464_s5, 32 }
  0xfc   :  { %p331_p5 = scmp.ne.s32.totalorder %s464_s5, %s330_s2  ;;  %p334_p6 = scmp.lt.u32.totalorder %s330_s2, %s464_s5 }
  0xfe   :  { %p336_p7 = pnand %p334_p6, %p331_p5 }
 0x100   :  { %339 = shalt.err (!%p336_p7)
}
 0x101   :  { %213 = dma.vmem_to_hbm [thread:$0]  %s211_s12, 32, %s464_s5, [#allocation3]   ;;  %v223_v34 = vld [vmem:[%s463_s4] ss:$0 sm:$0xff] }
 0x1cc   :  { %v198_v35 = vpop.f32.mrb[0].mxu1 }
 0x1cd   :  { %v199_v36 = vadd.f32 %v223_v34, %v198_v35  ;;  %v286_v37 = vpop.f32.mrb[1].mxu1 }
 0x1cf   :  { %v202_v38 = vmax.f32 %v199_v36, 0.0 }
 0x1d1   :  { %203 = vst [vmem:[%s465_s6] sm:$0x3] %v202_v38 }
 0x1d2   :  { %340 = dma.done.wait [#allocation3], 32  }
 0x1d3   :  { %341 = vsyncadd [#allocation3], 4294967264 }
 0x1d4   :  { %221 = vsyncpa [#allocation3], 1 }

// kernel: vanilla_conv_ae_forward.11
= control target key start
LH: loop header
LB: loop body
LE: loop exit
PB: predicated region body
PF: predicated region fallthrough
CT: control target
= control target key end

     0   :  { %v236_v0 = vmov 0.0|0.0   ;;  %vm237_vm0 = vmmov 0   ;;  %v238_v6 = vmov 0.0   ;;  %vm123_vm1 = vcmask 523264   ;;  %s331_s1 = inlined_call_operand.vmem [shape: f32[128,64], index: 1, kind: input, shape index: {}]   ;;  %s332_s0 = inlined_call_operand.vmem [shape: f32[18,128], index: 0, kind: input, shape index: {}]   ;;  %s333_s2 = inlined_call_operand.vmem [shape: f32[1,64], index: 2, kind: input, shape index: {}]   ;;  %s334_s3 = inlined_call_operand.vmem [shape: f32[18,64], index: 3, kind: output, shape index: {}]  }
   0x1   :  { %217 = vmatprep.subr.bf16.mxu1 %v236_v0  ;;  %v17_v1 = vld [vmem:[%s331_s1] sm:$0xff]  ;;  %v18_v2 = vld [vmem:[%s331_s1 + $0x8] sm:$0xff]  ;;  %193 = vmatprep.subr.bf16.mxu0 %v236_v0  ;;  %v19_v3 = vld [vmem:[%s331_s1 + $0x10] sm:$0xff]  ;;  %vm126_vm2 = vcmask 517120  }
   0x2   :  { %v194_v4 = vpack.c.bf16 %v18_v2, %v17_v1  ;;  %v20_v5 = vld [vmem:[%s331_s1 + $0x18] sm:$0xff]  ;;  %187 = vmatprep.mubr.msk.f32.mxu1 %vm237_vm0, %v238_v6  ;;  %184 = vmatprep.mubr.msk.f32.mxu0 %vm237_vm0, %v238_v6  ;;  %v21_v8 = vld [vmem:[%s331_s1 + $0x20] sm:$0xff]  ;;  %v22_v9 = vld [vmem:[%s331_s1 + $0x28] sm:$0xff] }
   0x3   :  { %v197_v7 = vpack.c.bf16 %v20_v5, %v19_v3  ;;  %v200_v10 = vpack.c.bf16 %v22_v9, %v21_v8  ;;  %v23_v11 = vld [vmem:[%s331_s1 + $0x30] sm:$0xff]  ;;  %v24_v12 = vld [vmem:[%s331_s1 + $0x38] sm:$0xff]  ;;  %v25_v14 = vld [vmem:[%s331_s1 + $0x40] sm:$0xff] }
   0x4   :  { %225 = vmatpush3.bf16.msra.mxu1 %v194_v4  ;;  %195 = vmatpush3.bf16.msra.mxu0 %v194_v4  ;;  %v203_v13 = vpack.c.bf16 %v24_v12, %v23_v11  ;;  %v26_v15 = vld [vmem:[%s331_s1 + $0x48] sm:$0xff]  ;;  %v27_v17 = vld [vmem:[%s331_s1 + $0x50] sm:$0xff]  ;;  %v28_v18 = vld [vmem:[%s331_s1 + $0x58] sm:$0xff] }
   0x5   :  { %218 = vmatprep.subr.bf16.mxu1 %v236_v0  ;;  %196 = vmatprep.subr.bf16.mxu0 %v236_v0  ;;  %v206_v16 = vpack.c.bf16 %v26_v15, %v25_v14  ;;  %v209_v19 = vpack.c.bf16 %v28_v18, %v27_v17  ;;  %v29_v20 = vld [vmem:[%s331_s1 + $0x60] sm:$0xff]  ;;  %v30_v21 = vld [vmem:[%s331_s1 + $0x68] sm:$0xff]  ;;  %v31_v23 = vld [vmem:[%s331_s1 + $0x70] sm:$0xff] }
   0x6   :  { %v212_v22 = vpack.c.bf16 %v30_v21, %v29_v20  ;;  %v32_v24 = vld [vmem:[%s331_s1 + $0x78] sm:$0xff]  ;;  %v15_v26 = vld [vmem:[%s332_s0 + $0x8] sm:$0xff]  ;;  %v14_v27 = vld [vmem:[%s332_s0] sm:$0xff] }
   0x7   :  { %v215_v25 = vpack.c.bf16 %v32_v24, %v31_v23  ;;  %v16_v28 = vld [vmem:[%s332_s0 + $0x10] sm:$0x3]  ;;  %v132_v29 = vld [vmem:[%s333_s2] ss:$0 sm:$0xff] }
   0x8   :  { %226 = vmatpush3.bf16.msra.mxu1 %v197_v7  ;;  %198 = vmatpush3.bf16.msra.mxu0 %v197_v7 }
   0x9   :  { %219 = vmatprep.subr.bf16.mxu1 %v236_v0  ;;  %199 = vmatprep.subr.bf16.mxu0 %v236_v0 }
   0xc   :  { %227 = vmatpush3.bf16.msra.mxu1 %v200_v10  ;;  %201 = vmatpush3.bf16.msra.mxu0 %v200_v10 }
   0xd   :  { %220 = vmatprep.subr.bf16.mxu1 %v236_v0  ;;  %202 = vmatprep.subr.bf16.mxu0 %v236_v0 }
  0x10   :  { %228 = vmatpush3.bf16.msra.mxu1 %v203_v13  ;;  %204 = vmatpush3.bf16.msra.mxu0 %v203_v13 }
  0x11   :  { %221 = vmatprep.subr.bf16.mxu1 %v236_v0  ;;  %205 = vmatprep.subr.bf16.mxu0 %v236_v0 }
  0x14   :  { %229 = vmatpush3.bf16.msra.mxu1 %v206_v16  ;;  %207 = vmatpush3.bf16.msra.mxu0 %v206_v16 }
  0x15   :  { %222 = vmatprep.subr.bf16.mxu1 %v236_v0  ;;  %208 = vmatprep.subr.bf16.mxu0 %v236_v0 }
  0x18   :  { %230 = vmatpush3.bf16.msra.mxu1 %v209_v19  ;;  %210 = vmatpush3.bf16.msra.mxu0 %v209_v19 }
  0x19   :  { %223 = vmatprep.subr.bf16.mxu1 %v236_v0  ;;  %211 = vmatprep.subr.bf16.mxu0 %v236_v0 }
  0x1c   :  { %231 = vmatpush3.bf16.msra.mxu1 %v212_v22  ;;  %213 = vmatpush3.bf16.msra.mxu0 %v212_v22 }
  0x1d   :  { %224 = vmatprep.subr.bf16.mxu1 %v236_v0  ;;  %214 = vmatprep.subr.bf16.mxu0 %v236_v0 }
  0x20   :  { %232 = vmatpush3.bf16.msra.mxu1 %v215_v25  ;;  %216 = vmatpush3.bf16.msra.mxu0 %v215_v25 }
  0x23   :  { %188 = vmatmul.mubr.f32.vlgmr.msra.gmra.mrb[0].mxu1 %v15_v26  ;;  %185 = vmatmul.mubr.f32.vlgmr.msra.gmra.mrb[0].mxu0 %v14_v27 }
  0x24   :  { %190 = vmatprep.mubr.msk.f32.mxu1 %vm237_vm0, %v238_v6 }
  0x27   :  { %191 = vmatmul.mubr.f32.gmra.mrb[2].mxu1 %v16_v28 }
  0xf6   :  { %v111_v30 = vpop.f32.mrb[0].mxu1  ;;  %v106_v31 = vpop.f32.mrb[0].mxu0 }
  0xf7   :  { %v112_v32 = vadd.f32 %v132_v29, %v111_v30  ;;  %v189_v33 = vpop.f32.mrb[1].mxu1  ;;  %v107_v34 = vadd.f32 %v132_v29, %v106_v31  ;;  %v186_v35 = vpop.f32.mrb[1].mxu0 }
  0xf9   :  { %v121_v36 = vmax.f32 %v112_v32, 0.0  ;;  %v120_v37 = vmax.f32 %v107_v34, 0.0 }
  0xfa   :  { %v116_v38 = vpop.f32.mrb[2].mxu1 }
  0xfb   :  { %125 = vst.msk [vmem:[%s334_s3 + $0x8] sm:$0xff] %vm123_vm1, %v121_v36  ;;  %124 = vst.msk [vmem:[%s334_s3] sm:$0xff] %vm123_vm1, %v120_v37  ;;  %v117_v39 = vadd.f32 %v132_v29, %v116_v38  ;;  %v192_v40 = vpop.f32.mrb[3].mxu1 }
  0xfd   :  { %v122_v41 = vmax.f32 %v117_v39, 0.0 }
  0xff   :  { %127 = vst.msk [vmem:[%s334_s3 + $0x10] sm:$0x3] %vm126_vm2, %v122_v41 }

// kernel: vanilla_conv_ae_forward.12
= control target key start
LH: loop header
LB: loop body
LE: loop exit
PB: predicated region body
PF: predicated region fallthrough
CT: control target
= control target key end

     0   :  { %v261_v0 = vmov 0.0|0.0   ;;  %vm262_vm0 = vmmov 0   ;;  %v263_v6 = vmov 0.0   ;;  %vm36_vm1 = vcmask 523264   ;;  %s373_s1 = inlined_call_operand.vmem [shape: f32[64,32], index: 1, kind: input, shape index: {}]   ;;  %s374_s0 = inlined_call_operand.vmem [shape: f32[50,64], index: 0, kind: input, shape index: {}]   ;;  %s375_s2 = inlined_call_operand.vmem [shape: f32[1,32], index: 2, kind: input, shape index: {}]   ;;  %s376_s3 = inlined_call_operand.vmem [shape: f32[50,32], index: 3, kind: output, shape index: {}]  }
   0x1   :  { %238 = vmatprep.subr.bf16.mxu0 %v261_v0  ;;  %v21_v1 = vld [vmem:[%s373_s1] sm:$0xff]  ;;  %v22_v2 = vld [vmem:[%s373_s1 + $0x8] sm:$0xff]  ;;  %250 = vmatprep.subr.bf16.mxu1 %v261_v0  ;;  %v23_v3 = vld [vmem:[%s373_s1 + $0x10] sm:$0xff]  ;;  %vm165_vm2 = vcmask 261120   ;;  %vm172_vm3 = vcmask 254976  }
   0x2   :  { %v239_v4 = vpack.c.bf16 %v22_v2, %v21_v1  ;;  %v24_v5 = vld [vmem:[%s373_s1 + $0x18] sm:$0xff]  ;;  %217 = vmatprep.mubr.msk.f32.mxu0 %vm262_vm0, %v263_v6  ;;  %229 = vmatprep.mubr.msk.f32.mxu1 %vm262_vm0, %v263_v6  ;;  %v25_v8 = vld [vmem:[%s373_s1 + $0x20] sm:$0xff]  ;;  %v26_v9 = vld [vmem:[%s373_s1 + $0x28] sm:$0xff] }
   0x3   :  { %v242_v7 = vpack.c.bf16 %v24_v5, %v23_v3  ;;  %v245_v10 = vpack.c.bf16 %v26_v9, %v25_v8  ;;  %v27_v11 = vld [vmem:[%s373_s1 + $0x30] sm:$0xff]  ;;  %v28_v12 = vld [vmem:[%s373_s1 + $0x38] sm:$0xff]  ;;  %v14_v14 = vld [vmem:[%s374_s0] sm:$0xff] }
   0x4   :  { %240 = vmatpush3.bf16.msra.mxu0 %v239_v4  ;;  %254 = vmatpush3.bf16.msra.mxu1 %v239_v4  ;;  %v248_v13 = vpack.c.bf16 %v28_v12, %v27_v11  ;;  %v18_v15 = vld [vmem:[%s374_s0 + $0x20] sm:$0xff]  ;;  %v15_v16 = vld [vmem:[%s374_s0 + $0x8] sm:$0xff]  ;;  %v16_v18 = vld [vmem:[%s374_s0 + $0x10] sm:$0xff] }
   0x5   :  { %241 = vmatprep.subr.bf16.mxu0 %v261_v0  ;;  %251 = vmatprep.subr.bf16.mxu1 %v261_v0  ;;  %v19_v17 = vld [vmem:[%s374_s0 + $0x28] sm:$0xff]  ;;  %v20_v19 = vld [vmem:[%s374_s0 + $0x30] sm:$0x3]  ;;  %v17_v20 = vld [vmem:[%s374_s0 + $0x18] sm:$0xff] }
   0x6   :  { %v178_v21 = vld [vmem:[%s375_s2] ss:$0 sm:$0xff] }
   0x8   :  { %243 = vmatpush3.bf16.msra.mxu0 %v242_v7  ;;  %255 = vmatpush3.bf16.msra.mxu1 %v242_v7 }
   0x9   :  { %244 = vmatprep.subr.bf16.mxu0 %v261_v0  ;;  %252 = vmatprep.subr.bf16.mxu1 %v261_v0 }
   0xc   :  { %246 = vmatpush3.bf16.msra.mxu0 %v245_v10  ;;  %256 = vmatpush3.bf16.msra.mxu1 %v245_v10 }
   0xd   :  { %247 = vmatprep.subr.bf16.mxu0 %v261_v0  ;;  %253 = vmatprep.subr.bf16.mxu1 %v261_v0 }
  0x10   :  { %249 = vmatpush3.bf16.msra.mxu0 %v248_v13  ;;  %257 = vmatpush3.bf16.msra.mxu1 %v248_v13 }
  0x13   :  { %218 = vmatmul.mubr.msk.f32.vlgmr.msra.gmra.mrb[0].mxu0 %vm36_vm1, %v14_v14  ;;  %230 = vmatmul.mubr.msk.f32.vlgmr.msra.gmra.mrb[0].mxu1 %vm36_vm1, %v18_v15 }
  0x14   :  { %220 = vmatprep.mubr.msk.f32.mxu0 %vm262_vm0, %v263_v6  ;;  %232 = vmatprep.mubr.msk.f32.mxu1 %vm262_vm0, %v263_v6 }
  0x17   :  { %221 = vmatmul.mubr.msk.f32.gmra.mrb[2].mxu0 %vm36_vm1, %v15_v16  ;;  %233 = vmatmul.mubr.msk.f32.gmra.mrb[2].mxu1 %vm36_vm1, %v19_v17 }
  0x18   :  { %223 = vmatprep.mubr.msk.f32.mxu0 %vm262_vm0, %v263_v6  ;;  %235 = vmatprep.mubr.msk.f32.mxu1 %vm262_vm0, %v263_v6 }
  0x1b   :  { %224 = vmatmul.mubr.msk.f32.gmra.mrb[4].mxu0 %vm36_vm1, %v16_v18  ;;  %236 = vmatmul.mubr.msk.f32.gmra.mrb[4].mxu1 %vm36_vm1, %v20_v19 }
  0x1c   :  { %226 = vmatprep.mubr.msk.f32.mxu0 %vm262_vm0, %v263_v6 }
  0x1f   :  { %227 = vmatmul.mubr.msk.f32.gmra.mrb[6].mxu0 %vm36_vm1, %v17_v20 }
  0xe6   :  { %v124_v22 = vpop.f32.mrb[0].mxu0  ;;  %v144_v23 = vpop.f32.mrb[0].mxu1 }
  0xe7   :  { %v125_v24 = vadd.f32 %v178_v21, %v124_v22  ;;  %v219_v25 = vpop.f32.mrb[1].mxu0  ;;  %v145_v26 = vadd.f32 %v178_v21, %v144_v23  ;;  %v231_v27 = vpop.f32.mrb[1].mxu1 }
  0xe9   :  { %v158_v28 = vmax.f32 %v125_v24, 0.0  ;;  %v162_v29 = vmax.f32 %v145_v26, 0.0 }
  0xea   :  { %v129_v30 = vpop.f32.mrb[2].mxu0  ;;  %v149_v31 = vpop.f32.mrb[2].mxu1 }
  0xeb   :  { %166 = vst.msk [vmem:[%s376_s3] sm:$0xff] %vm165_vm2, %v158_v28  ;;  %170 = vst.msk [vmem:[%s376_s3 + $0x20] sm:$0xff] %vm165_vm2, %v162_v29  ;;  %v130_v32 = vadd.f32 %v178_v21, %v129_v30  ;;  %v222_v33 = vpop.f32.mrb[3].mxu0  ;;  %v150_v34 = vadd.f32 %v178_v21, %v149_v31  ;;  %v234_v35 = vpop.f32.mrb[3].mxu1 }
  0xed   :  { %v159_v36 = vmax.f32 %v130_v32, 0.0  ;;  %v163_v37 = vmax.f32 %v150_v34, 0.0 }
  0xee   :  { %v134_v38 = vpop.f32.mrb[4].mxu0  ;;  %v154_v39 = vpop.f32.mrb[4].mxu1 }
  0xef   :  { %167 = vst.msk [vmem:[%s376_s3 + $0x8] sm:$0xff] %vm165_vm2, %v159_v36  ;;  %171 = vst.msk [vmem:[%s376_s3 + $0x28] sm:$0xff] %vm165_vm2, %v163_v37  ;;  %v135_v40 = vadd.f32 %v178_v21, %v134_v38  ;;  %v225_v41 = vpop.f32.mrb[5].mxu0  ;;  %v155_v42 = vadd.f32 %v178_v21, %v154_v39  ;;  %v237_v43 = vpop.f32.mrb[5].mxu1 }
  0xf1   :  { %v160_v44 = vmax.f32 %v135_v40, 0.0  ;;  %v164_v45 = vmax.f32 %v155_v42, 0.0 }
  0xf2   :  { %v139_v46 = vpop.f32.mrb[6].mxu0 }
  0xf3   :  { %168 = vst.msk [vmem:[%s376_s3 + $0x10] sm:$0xff] %vm165_vm2, %v160_v44  ;;  %v140_v47 = vadd.f32 %v178_v21, %v139_v46  ;;  %v228_v48 = vpop.f32.mrb[7].mxu0 }
  0xf4   :  { %173 = vst.msk [vmem:[%s376_s3 + $0x30] sm:$0x3] %vm172_vm3, %v164_v45 }
  0xf5   :  { %v161_v49 = vmax.f32 %v140_v47, 0.0 }
  0xf7   :  { %169 = vst.msk [vmem:[%s376_s3 + $0x18] sm:$0xff] %vm165_vm2, %v161_v49 }

// kernel: vanilla_conv_ae_forward.13
= control target key start
LH: loop header
LB: loop body
LE: loop exit
PB: predicated region body
PF: predicated region fallthrough
CT: control target
= control target key end

     0   :  { %v669_v0 = vmov 0.0|0.0   ;;  %vm670_vm0 = vmmov 0   ;;  %v671_v6 = vmov 0.0   ;;  %vm46_vm1 = vcmask 261120   ;;  %s939_s1 = inlined_call_operand.vmem [shape: f32[32,4], index: 1, kind: input, shape index: {}]   ;;  %s940_s0 = inlined_call_operand.vmem [shape: f32[162,32], index: 0, kind: input, shape index: {}]   ;;  %s941_s2 = inlined_call_operand.vmem [shape: f32[1,4], index: 2, kind: input, shape index: {}]   ;;  %s942_s3 = inlined_call_operand.vmem [shape: f32[162,4], index: 3, kind: output, shape index: {}]  }
   0x1   :  { %572 = vmatprep.subr.bf16.mxu0 %v669_v0  ;;  %v35_v1 = vld [vmem:[%s939_s1] sm:$0xff]  ;;  %v36_v2 = vld [vmem:[%s939_s1 + $0x8] sm:$0xff]  ;;  %578 = vmatprep.subr.bf16.mxu1 %v669_v0  ;;  %v37_v3 = vld [vmem:[%s939_s1 + $0x10] sm:$0xff]  ;;  %vm406_vm2 = vcmask 31744   ;;  %vm427_vm3 = vcmask 25600  }
   0x2   :  { %v573_v4 = vpack.c.bf16 %v36_v2, %v35_v1  ;;  %v38_v5 = vld [vmem:[%s939_s1 + $0x18] sm:$0xff]  ;;  %509 = vmatprep.mubr.msk.f32.mxu0 %vm670_vm0, %v671_v6  ;;  %542 = vmatprep.mubr.msk.f32.mxu1 %vm670_vm0, %v671_v6  ;;  %v14_v8 = vld [vmem:[%s940_s0] sm:$0xff]  ;;  %v15_v10 = vld [vmem:[%s940_s0 + $0x8] sm:$0xff] }
   0x3   :  { %v576_v7 = vpack.c.bf16 %v38_v5, %v37_v3  ;;  %v25_v9 = vld [vmem:[%s940_s0 + $0x58] sm:$0xff]  ;;  %v26_v11 = vld [vmem:[%s940_s0 + $0x60] sm:$0xff]  ;;  %v16_v12 = vld [vmem:[%s940_s0 + $0x10] sm:$0xff] }
   0x4   :  { %574 = vmatpush3.bf16.msra.mxu0 %v573_v4  ;;  %580 = vmatpush3.bf16.msra.mxu1 %v573_v4  ;;  %v27_v13 = vld [vmem:[%s940_s0 + $0x68] sm:$0xff]  ;;  %v17_v14 = vld [vmem:[%s940_s0 + $0x18] sm:$0xff]  ;;  %v28_v15 = vld [vmem:[%s940_s0 + $0x70] sm:$0xff] }
   0x5   :  { %575 = vmatprep.subr.bf16.mxu0 %v669_v0  ;;  %579 = vmatprep.subr.bf16.mxu1 %v669_v0  ;;  %v18_v16 = vld [vmem:[%s940_s0 + $0x20] sm:$0xff]  ;;  %v29_v17 = vld [vmem:[%s940_s0 + $0x78] sm:$0xff]  ;;  %v19_v18 = vld [vmem:[%s940_s0 + $0x28] sm:$0xff] }
   0x6   :  { %v30_v19 = vld [vmem:[%s940_s0 + $0x80] sm:$0xff]  ;;  %v20_v20 = vld [vmem:[%s940_s0 + $0x30] sm:$0xff]  ;;  %v31_v21 = vld [vmem:[%s940_s0 + $0x88] sm:$0xff] }
   0x7   :  { %v21_v22 = vld [vmem:[%s940_s0 + $0x38] sm:$0xff]  ;;  %v32_v23 = vld [vmem:[%s940_s0 + $0x90] sm:$0xff]  ;;  %v22_v24 = vld [vmem:[%s940_s0 + $0x40] sm:$0xff] }
   0x8   :  { %577 = vmatpush3.bf16.msra.mxu0 %v576_v7  ;;  %581 = vmatpush3.bf16.msra.mxu1 %v576_v7  ;;  %v33_v25 = vld [vmem:[%s940_s0 + $0x98] sm:$0xff]  ;;  %v23_v26 = vld [vmem:[%s940_s0 + $0x48] sm:$0xff]  ;;  %v34_v27 = vld [vmem:[%s940_s0 + $0xa0] sm:$0x3] }
   0x9   :  { %v24_v28 = vld [vmem:[%s940_s0 + $0x50] sm:$0xff]  ;;  %v833_v29 = vld [vmem:[%s941_s2] ss:$0 sm:$0xff] }
   0xb   :  { %510 = vmatmul.mubr.msk.f32.vlgmr.msra.gmra.mrb[0].mxu0 %vm46_vm1, %v14_v8  ;;  %543 = vmatmul.mubr.msk.f32.vlgmr.msra.gmra.mrb[0].mxu1 %vm46_vm1, %v25_v9 }
   0xc   :  { %512 = vmatprep.mubr.msk.f32.mxu0 %vm670_vm0, %v671_v6  ;;  %545 = vmatprep.mubr.msk.f32.mxu1 %vm670_vm0, %v671_v6 }
   0xf   :  { %513 = vmatmul.mubr.msk.f32.gmra.mrb[2].mxu0 %vm46_vm1, %v15_v10  ;;  %546 = vmatmul.mubr.msk.f32.gmra.mrb[2].mxu1 %vm46_vm1, %v26_v11 }
  0x10   :  { %515 = vmatprep.mubr.msk.f32.mxu0 %vm670_vm0, %v671_v6  ;;  %548 = vmatprep.mubr.msk.f32.mxu1 %vm670_vm0, %v671_v6 }
  0x13   :  { %516 = vmatmul.mubr.msk.f32.gmra.mrb[4].mxu0 %vm46_vm1, %v16_v12  ;;  %549 = vmatmul.mubr.msk.f32.gmra.mrb[4].mxu1 %vm46_vm1, %v27_v13 }
  0x14   :  { %518 = vmatprep.mubr.msk.f32.mxu0 %vm670_vm0, %v671_v6  ;;  %551 = vmatprep.mubr.msk.f32.mxu1 %vm670_vm0, %v671_v6 }
  0x17   :  { %519 = vmatmul.mubr.msk.f32.gmra.mrb[6].mxu0 %vm46_vm1, %v17_v14  ;;  %552 = vmatmul.mubr.msk.f32.gmra.mrb[6].mxu1 %vm46_vm1, %v28_v15 }
  0x18   :  { %521 = vmatprep.mubr.msk.f32.mxu0 %vm670_vm0, %v671_v6  ;;  %554 = vmatprep.mubr.msk.f32.mxu1 %vm670_vm0, %v671_v6 }
  0x1b   :  { %522 = vmatmul.mubr.msk.f32.gmra.mrb[8].mxu0 %vm46_vm1, %v18_v16  ;;  %555 = vmatmul.mubr.msk.f32.gmra.mrb[8].mxu1 %vm46_vm1, %v29_v17 }
  0x1c   :  { %524 = vmatprep.mubr.msk.f32.mxu0 %vm670_vm0, %v671_v6  ;;  %557 = vmatprep.mubr.msk.f32.mxu1 %vm670_vm0, %v671_v6 }
  0x1f   :  { %525 = vmatmul.mubr.msk.f32.gmra.mrb[10].mxu0 %vm46_vm1, %v19_v18  ;;  %558 = vmatmul.mubr.msk.f32.gmra.mrb[10].mxu1 %vm46_vm1, %v30_v19 }
  0x20   :  { %527 = vmatprep.mubr.msk.f32.mxu0 %vm670_vm0, %v671_v6  ;;  %560 = vmatprep.mubr.msk.f32.mxu1 %vm670_vm0, %v671_v6 }
  0x23   :  { %528 = vmatmul.mubr.msk.f32.gmra.mrb[12].mxu0 %vm46_vm1, %v20_v20  ;;  %561 = vmatmul.mubr.msk.f32.gmra.mrb[12].mxu1 %vm46_vm1, %v31_v21 }
  0x24   :  { %530 = vmatprep.mubr.msk.f32.mxu0 %vm670_vm0, %v671_v6  ;;  %563 = vmatprep.mubr.msk.f32.mxu1 %vm670_vm0, %v671_v6 }
  0x27   :  { %531 = vmatmul.mubr.msk.f32.gmra.mrb[14].mxu0 %vm46_vm1, %v21_v22  ;;  %564 = vmatmul.mubr.msk.f32.gmra.mrb[14].mxu1 %vm46_vm1, %v32_v23 }
  0x28   :  { %533 = vmatprep.mubr.msk.f32.mxu0 %vm670_vm0, %v671_v6  ;;  %566 = vmatprep.mubr.msk.f32.mxu1 %vm670_vm0, %v671_v6 }
  0x2b   :  { %534 = vmatmul.mubr.msk.f32.gmra.mrb[16].mxu0 %vm46_vm1, %v22_v24  ;;  %567 = vmatmul.mubr.msk.f32.gmra.mrb[16].mxu1 %vm46_vm1, %v33_v25 }
  0x2c   :  { %536 = vmatprep.mubr.msk.f32.mxu0 %vm670_vm0, %v671_v6  ;;  %569 = vmatprep.mubr.msk.f32.mxu1 %vm670_vm0, %v671_v6 }
  0x2f   :  { %537 = vmatmul.mubr.msk.f32.gmra.mrb[18].mxu0 %vm46_vm1, %v23_v26  ;;  %570 = vmatmul.mubr.msk.f32.gmra.mrb[18].mxu1 %vm46_vm1, %v34_v27 }
  0x30   :  { %539 = vmatprep.mubr.msk.f32.mxu0 %vm670_vm0, %v671_v6 }
  0x33   :  { %540 = vmatmul.mubr.msk.f32.gmra.mrb[20].mxu0 %vm46_vm1, %v24_v28 }
  0xde   :  { %v176_v30 = vpop.f32.mrb[0].mxu0  ;;  %v231_v31 = vpop.f32.mrb[0].mxu1 }
  0xdf   :  { %v177_v32 = vadd.f32 %v833_v29, %v176_v30  ;;  %v511_v33 = vpop.f32.mrb[1].mxu0  ;;  %v232_v34 = vadd.f32 %v833_v29, %v231_v31  ;;  %v544_v35 = vpop.f32.mrb[1].mxu1 }
  0xe1   :  { %v455_v36 = vmul.f32 -1.442695, %v177_v32  ;;  %v466_v37 = vmul.f32 -1.442695, %v232_v34 }
  0xe2   :  { %v181_v38 = vpop.f32.mrb[2].mxu0  ;;  %v236_v39 = vpop.f32.mrb[2].mxu1 }
  0xe3   :  { %585 = vpow2.f32 %v455_v36  ;;  %v182_v40 = vadd.f32 %v833_v29, %v181_v38  ;;  %v514_v41 = vpop.f32.mrb[3].mxu0  ;;  %v237_v42 = vadd.f32 %v833_v29, %v236_v39  ;;  %v547_v43 = vpop.f32.mrb[3].mxu1 }
  0xe4   :  { %587 = vpow2.f32 %v466_v37 }
  0xe5   :  { %v456_v44 = vmul.f32 -1.442695, %v182_v40  ;;  %v467_v45 = vmul.f32 -1.442695, %v237_v42 }
  0xe6   :  { %v186_v46 = vpop.f32.mrb[4].mxu0  ;;  %v241_v47 = vpop.f32.mrb[4].mxu1 }
  0xe7   :  { %589 = vpow2.f32 %v456_v44  ;;  %v187_v48 = vadd.f32 %v833_v29, %v186_v46  ;;  %v517_v49 = vpop.f32.mrb[5].mxu0  ;;  %v242_v50 = vadd.f32 %v833_v29, %v241_v47  ;;  %v550_v51 = vpop.f32.mrb[5].mxu1 }
  0xe8   :  { %591 = vpow2.f32 %v467_v45 }
  0xe9   :  { %v457_v52 = vmul.f32 -1.442695, %v187_v48  ;;  %v468_v53 = vmul.f32 -1.442695, %v242_v50 }
  0xea   :  { %v191_v54 = vpop.f32.mrb[6].mxu0  ;;  %v246_v55 = vpop.f32.mrb[6].mxu1 }
  0xeb   :  { %593 = vpow2.f32 %v457_v52  ;;  %v192_v56 = vadd.f32 %v833_v29, %v191_v54  ;;  %v520_v57 = vpop.f32.mrb[7].mxu0  ;;  %v247_v58 = vadd.f32 %v833_v29, %v246_v55  ;;  %v553_v59 = vpop.f32.mrb[7].mxu1 }
  0xec   :  { %595 = vpow2.f32 %v468_v53 }
  0xed   :  { %v586_v60 = vpop.eup %585  ;;  %v458_v61 = vmul.f32 -1.442695, %v192_v56  ;;  %v469_v0 = vmul.f32 -1.442695, %v247_v58 }
  0xee   :  { %v588_v62 = vpop.eup %587  ;;  %v343_v63 = vadd.f32 1.0, %v586_v60  ;;  %v196_v1 = vpop.f32.mrb[8].mxu0 }
  0xef   :  { %v251_v2 = vpop.f32.mrb[8].mxu1  ;;  %v354_v3 = vadd.f32 1.0, %v588_v62  ;;  %597 = vpow2.f32 %v458_v61  ;;  %v197_v4 = vadd.f32 %v833_v29, %v196_v1  ;;  %v523_v5 = vpop.f32.mrb[9].mxu0 }
  0xf0   :  { %v252_v6 = vadd.f32 %v833_v29, %v251_v2  ;;  %v556_v7 = vpop.f32.mrb[9].mxu1  ;;  %599 = vrcp.f32 %v343_v63 }
  0xf1   :  { %v590_v8 = vpop.eup %589  ;;  %601 = vrcp.f32 %v354_v3  ;;  %v459_v9 = vmul.f32 -1.442695, %v197_v4 }
  0xf2   :  { %v592_v10 = vpop.eup %591  ;;  %v344_v11 = vadd.f32 1.0, %v590_v8  ;;  %603 = vpow2.f32 %v469_v0  ;;  %v470_v12 = vmul.f32 -1.442695, %v252_v6  ;;  %v201_v13 = vpop.f32.mrb[10].mxu0 }
  0xf3   :  { %v256_v14 = vpop.f32.mrb[10].mxu1  ;;  %v355_v15 = vadd.f32 1.0, %v592_v10  ;;  %605 = vpow2.f32 %v459_v9  ;;  %v202_v16 = vadd.f32 %v833_v29, %v201_v13  ;;  %v526_v17 = vpop.f32.mrb[11].mxu0 }
  0xf4   :  { %v257_v18 = vadd.f32 %v833_v29, %v256_v14  ;;  %v559_v19 = vpop.f32.mrb[11].mxu1  ;;  %607 = vrcp.f32 %v344_v11 }
  0xf5   :  { %v594_v20 = vpop.eup %593  ;;  %609 = vrcp.f32 %v355_v15  ;;  %v460_v21 = vmul.f32 -1.442695, %v202_v16 }
  0xf6   :  { %v596_v22 = vpop.eup %595  ;;  %v345_v23 = vadd.f32 1.0, %v594_v20  ;;  %611 = vpow2.f32 %v470_v12  ;;  %v471_v24 = vmul.f32 -1.442695, %v257_v18  ;;  %v206_v25 = vpop.f32.mrb[12].mxu0 }
  0xf7   :  { %v261_v26 = vpop.f32.mrb[12].mxu1  ;;  %v356_v27 = vadd.f32 1.0, %v596_v22  ;;  %613 = vpow2.f32 %v460_v21  ;;  %v207_v28 = vadd.f32 %v833_v29, %v206_v25  ;;  %v529_v30 = vpop.f32.mrb[13].mxu0 }
  0xf8   :  { %v262_v31 = vadd.f32 %v833_v29, %v261_v26  ;;  %v562_v32 = vpop.f32.mrb[13].mxu1  ;;  %615 = vrcp.f32 %v345_v23 }
  0xf9   :  { %v598_v33 = vpop.eup %597  ;;  %617 = vrcp.f32 %v356_v27  ;;  %v461_v34 = vmul.f32 -1.442695, %v207_v28 }
  0xfa   :  { %v472_v35 = vmul.f32 -1.442695, %v262_v31  ;;  %v600_v36 = vpop.eup %599  ;;  %v346_v37 = vadd.f32 1.0, %v598_v33  ;;  %619 = vpow2.f32 %v471_v24  ;;  %v211_v38 = vpop.f32.mrb[14].mxu0 }
  0xfb   :  { %v266_v39 = vpop.f32.mrb[14].mxu1  ;;  %v602_v40 = vpop.eup %601  ;;  %407 = vst.msk [vmem:[%s942_s3] sm:$0xff] %vm406_vm2, %v600_v36  ;;  %621 = vpow2.f32 %v461_v34  ;;  %v212_v41 = vadd.f32 %v833_v29, %v211_v38 }
  0xfc   :  { %v532_v42 = vpop.f32.mrb[15].mxu0  ;;  %v267_v43 = vadd.f32 %v833_v29, %v266_v39  ;;  %v565_v44 = vpop.f32.mrb[15].mxu1  ;;  %418 = vst.msk [vmem:[%s942_s3 + $0x58] sm:$0xff] %vm406_vm2, %v602_v40  ;;  %623 = vrcp.f32 %v346_v37 }
  0xfd   :  { %v604_v45 = vpop.eup %603  ;;  %625 = vpow2.f32 %v472_v35  ;;  %v462_v48 = vmul.f32 -1.442695, %v212_v41 }
  0xfe   :  { %v606_v46 = vpop.eup %605  ;;  %v357_v47 = vadd.f32 1.0, %v604_v45  ;;  %v473_v51 = vmul.f32 -1.442695, %v267_v43  ;;  %v216_v52 = vpop.f32.mrb[16].mxu0 }
  0xff   :  { %v608_v49 = vpop.eup %607  ;;  %v347_v50 = vadd.f32 1.0, %v606_v46  ;;  %v271_v53 = vpop.f32.mrb[16].mxu1  ;;  %v217_v55 = vadd.f32 %v833_v29, %v216_v52 }
 0x100   :  { %v610_v54 = vpop.eup %609  ;;  %408 = vst.msk [vmem:[%s942_s3 + $0x8] sm:$0xff] %vm406_vm2, %v608_v49  ;;  %627 = vrcp.f32 %v357_v47  ;;  %v535_v56 = vpop.f32.mrb[17].mxu0  ;;  %v272_v57 = vadd.f32 %v833_v29, %v271_v53 }
 0x101   :  { %v568_v58 = vpop.f32.mrb[17].mxu1  ;;  %v612_v59 = vpop.eup %611  ;;  %419 = vst.msk [vmem:[%s942_s3 + $0x60] sm:$0xff] %vm406_vm2, %v610_v54  ;;  %629 = vrcp.f32 %v347_v50  ;;  %v463_v62 = vmul.f32 -1.442695, %v217_v55 }
 0x102   :  { %v614_v60 = vpop.eup %613  ;;  %v358_v61 = vadd.f32 1.0, %v612_v59  ;;  %631 = vpow2.f32 %v462_v48  ;;  %v474_v1 = vmul.f32 -1.442695, %v272_v57  ;;  %v221_v2 = vpop.f32.mrb[18].mxu0 }
 0x103   :  { %v616_v63 = vpop.eup %615  ;;  %v348_v0 = vadd.f32 1.0, %v614_v60  ;;  %633 = vpow2.f32 %v473_v51  ;;  %v276_v3 = vpop.f32.mrb[18].mxu1  ;;  %v222_v5 = vadd.f32 %v833_v29, %v221_v2 }
 0x104   :  { %v618_v4 = vpop.eup %617  ;;  %409 = vst.msk [vmem:[%s942_s3 + $0x10] sm:$0xff] %vm406_vm2, %v616_v63  ;;  %635 = vrcp.f32 %v358_v61  ;;  %v538_v6 = vpop.f32.mrb[19].mxu0  ;;  %v277_v7 = vadd.f32 %v833_v29, %v276_v3 }
 0x105   :  { %v571_v8 = vpop.f32.mrb[19].mxu1  ;;  %v620_v9 = vpop.eup %619  ;;  %420 = vst.msk [vmem:[%s942_s3 + $0x68] sm:$0xff] %vm406_vm2, %v618_v4  ;;  %637 = vrcp.f32 %v348_v0  ;;  %v464_v12 = vmul.f32 -1.442695, %v222_v5 }
 0x106   :  { %v622_v10 = vpop.eup %621  ;;  %v359_v11 = vadd.f32 1.0, %v620_v9  ;;  %639 = vpow2.f32 %v463_v62  ;;  %v226_v15 = vpop.f32.mrb[20].mxu0  ;;  %v475_v17 = vmul.f32 -1.442695, %v277_v7 }
 0x107   :  { %v624_v13 = vpop.eup %623  ;;  %v349_v14 = vadd.f32 1.0, %v622_v10  ;;  %641 = vpow2.f32 %v474_v1  ;;  %v227_v18 = vadd.f32 %v833_v29, %v226_v15  ;;  %v541_v19 = vpop.f32.mrb[21].mxu0 }
 0x108   :  { %v626_v16 = vpop.eup %625  ;;  %410 = vst.msk [vmem:[%s942_s3 + $0x18] sm:$0xff] %vm406_vm2, %v624_v13  ;;  %643 = vrcp.f32 %v359_v11 }
 0x109   :  { %645 = vrcp.f32 %v349_v14  ;;  %v360_v20 = vadd.f32 1.0, %v626_v16  ;;  %v465_v22 = vmul.f32 -1.442695, %v227_v18 }
 0x10a   :  { %v628_v21 = vpop.eup %627  ;;  %647 = vpow2.f32 %v464_v12 }
 0x10b   :  { %v630_v23 = vpop.eup %629  ;;  %421 = vst.msk [vmem:[%s942_s3 + $0x70] sm:$0xff] %vm406_vm2, %v628_v21  ;;  %649 = vrcp.f32 %v360_v20 }
 0x10c   :  { %v632_v24 = vpop.eup %631  ;;  %411 = vst.msk [vmem:[%s942_s3 + $0x20] sm:$0xff] %vm406_vm2, %v630_v23  ;;  %651 = vpow2.f32 %v475_v17 }
 0x10d   :  { %v634_v29 = vpop.eup %633  ;;  %v350_v25 = vadd.f32 1.0, %v632_v24  ;;  %653 = vpow2.f32 %v465_v22 }
 0x10e   :  { %v636_v26 = vpop.eup %635  ;;  %v361_v27 = vadd.f32 1.0, %v634_v29 }
 0x10f   :  { %v638_v28 = vpop.eup %637  ;;  %422 = vst.msk [vmem:[%s942_s3 + $0x78] sm:$0xff] %vm406_vm2, %v636_v26  ;;  %655 = vrcp.f32 %v350_v25 }
 0x110   :  { %v640_v30 = vpop.eup %639  ;;  %412 = vst.msk [vmem:[%s942_s3 + $0x28] sm:$0xff] %vm406_vm2, %v638_v28  ;;  %657 = vrcp.f32 %v361_v27 }
 0x111   :  { %v642_v31 = vpop.eup %641  ;;  %v351_v32 = vadd.f32 1.0, %v640_v30 }
 0x112   :  { %v644_v33 = vpop.eup %643  ;;  %v362_v34 = vadd.f32 1.0, %v642_v31 }
 0x113   :  { %v646_v35 = vpop.eup %645  ;;  %423 = vst.msk [vmem:[%s942_s3 + $0x80] sm:$0xff] %vm406_vm2, %v644_v33  ;;  %659 = vrcp.f32 %v351_v32 }
 0x114   :  { %v648_v36 = vpop.eup %647  ;;  %413 = vst.msk [vmem:[%s942_s3 + $0x30] sm:$0xff] %vm406_vm2, %v646_v35  ;;  %661 = vrcp.f32 %v362_v34 }
 0x115   :  { %v650_v37 = vpop.eup %649  ;;  %v352_v38 = vadd.f32 1.0, %v648_v36 }
 0x116   :  { %v652_v39 = vpop.eup %651  ;;  %424 = vst.msk [vmem:[%s942_s3 + $0x88] sm:$0xff] %vm406_vm2, %v650_v37 }
 0x117   :  { %v654_v40 = vpop.eup %653  ;;  %663 = vrcp.f32 %v352_v38  ;;  %v363_v41 = vadd.f32 1.0, %v652_v39 }
 0x118   :  { %v353_v42 = vadd.f32 1.0, %v654_v40 }
 0x119   :  { %v656_v43 = vpop.eup %655  ;;  %665 = vrcp.f32 %v363_v41 }
 0x11a   :  { %v658_v44 = vpop.eup %657  ;;  %414 = vst.msk [vmem:[%s942_s3 + $0x38] sm:$0xff] %vm406_vm2, %v656_v43  ;;  %667 = vrcp.f32 %v353_v42 }
 0x11b   :  { %425 = vst.msk [vmem:[%s942_s3 + $0x90] sm:$0xff] %vm406_vm2, %v658_v44 }
 0x11d   :  { %v660_v45 = vpop.eup %659 }
 0x11e   :  { %v662_v46 = vpop.eup %661  ;;  %415 = vst.msk [vmem:[%s942_s3 + $0x40] sm:$0xff] %vm406_vm2, %v660_v45 }
 0x11f   :  { %426 = vst.msk [vmem:[%s942_s3 + $0x98] sm:$0xff] %vm406_vm2, %v662_v46 }
 0x121   :  { %v664_v47 = vpop.eup %663 }
 0x122   :  { %416 = vst.msk [vmem:[%s942_s3 + $0x48] sm:$0xff] %vm406_vm2, %v664_v47 }
 0x123   :  { %v666_v48 = vpop.eup %665 }
 0x124   :  { %v668_v49 = vpop.eup %667  ;;  %428 = vst.msk [vmem:[%s942_s3 + $0xa0] sm:$0x3] %vm427_vm3, %v666_v48 }
 0x125   :  { %417 = vst.msk [vmem:[%s942_s3 + $0x50] sm:$0xff] %vm406_vm2, %v668_v49 }

</bundles_post_ra>
